<compile_context>
chip_gen: v7x
topology: tpu7x:2x2x1
jax: 0.10.0
libtpu: 0.0.40
codegen_flags: <defaults>
</compile_context>

<pallas_src>
import functools

import jax
import jax.numpy as jnp
from jax import lax
from jax.experimental import pallas as pl
from jax.experimental.pallas import tpu as pltpu

_VMEM = functools.partial(pl.BlockSpec, memory_space=pltpu.MemorySpace.VMEM)


def _align8(n: int) -> int:
    return ((n + 7) // 8) * 8


# ----------------------------------------------------------------------------
# Plain-JAX glue: densify graph structure into small operator matrices.
# ----------------------------------------------------------------------------
def build_graph_operators(edge_index, edge_sequence, batch, num_nodes, num_graphs):
    src, dst = edge_index[0], edge_index[1]
    not_loop = (src != dst).astype(jnp.float32)

    # ChebConv K=2 scaled Laplacian (lambda_max=2): S = -D^{-1/2} A D^{-1/2}.
    deg = jnp.zeros((num_nodes,), jnp.float32).at[src].add(not_loop)
    dinv = jnp.where(deg > 0, lax.rsqrt(deg), 0.0)
    norm = -dinv[src] * dinv[dst] * not_loop
    S = jnp.zeros((num_nodes, num_nodes), jnp.float32).at[dst, src].add(norm)

    # GAT support/count matrix: existing self-loops removed, one self-loop added.
    C = jnp.zeros((num_nodes, num_nodes), jnp.float32).at[dst, src].add(not_loop)
    C = C + jnp.eye(num_nodes, dtype=jnp.float32)

    # edge -> node MEAN aggregation operator (1/edge_count folded in host-side).
    node_ids = jnp.arange(num_nodes)
    M = (src[None, :] == node_ids[:, None]).astype(jnp.float32) + \
        (dst[None, :] == node_ids[:, None]).astype(jnp.float32)        # [N, E]
    cnt = jnp.sum(M, axis=1, keepdims=True)
    inv_cnt = jnp.where(cnt == 0.0, 1.0, 1.0 / cnt)
    M_scaled = M * inv_cnt                                             # [N, E]

    # one-hot gather matrices for the GRU edge-sequence endpoints.
    Gsrc = (edge_sequence[0][:, None] == node_ids[None, :]).astype(jnp.float32)
    Gdst = (edge_sequence[1][:, None] == node_ids[None, :]).astype(jnp.float32)

    # global_mean_pool matrix [G, N].
    onehot = (batch[None, :] == jnp.arange(num_graphs)[:, None]).astype(jnp.float32)
    P = onehot / jnp.maximum(jnp.sum(onehot, axis=1, keepdims=True), 1.0)
    return S, C, M_scaled, P, Gsrc, Gdst


def init_params(key, input_dim, h1, h2, rh):
    ks = jax.random.split(key, 17)
    s = 0.2
    return {
        "cheb_w0": s * jax.random.normal(ks[0], (input_dim, h1), jnp.float32),
        "cheb_w1": s * jax.random.normal(ks[1], (input_dim, h1), jnp.float32),
        "cheb_b": s * jax.random.normal(ks[2], (1, h1), jnp.float32),
        "bn_gamma": 1.0 + s * jax.random.normal(ks[3], (1, h1), jnp.float32),
        "bn_beta": s * jax.random.normal(ks[4], (1, h1), jnp.float32),
        "bn_mean": s * jax.random.normal(ks[5], (1, h1), jnp.float32),
        "bn_var": 1.0 + 0.1 * jax.random.uniform(ks[6], (1, h1), jnp.float32),
        "gru_wih": s * jax.random.normal(ks[7], (2 * h1, 3 * rh), jnp.float32),
        "gru_whh": s * jax.random.normal(ks[8], (rh, 3 * rh), jnp.float32),
        "gru_bih": s * jax.random.normal(ks[9], (1, 3 * rh), jnp.float32),
        "gru_bhh": s * jax.random.normal(ks[10], (1, 3 * rh), jnp.float32),
        "gat_w": s * jax.random.normal(ks[11], (h1 + rh, h2), jnp.float32),
        "gat_asrc": s * jax.random.normal(ks[12], (1, h2), jnp.float32),
        "gat_adst": s * jax.random.normal(ks[13], (1, h2), jnp.float32),
        "gat_b": s * jax.random.normal(ks[14], (1, h2), jnp.float32),
        "lin_w": s * jax.random.normal(ks[15], (h2, 1), jnp.float32),
        "lin_b": s * jax.random.normal(ks[16], (1, 1), jnp.float32),
    }


@functools.partial(jax.jit, static_argnames=("num_graphs",))
def sequential_rnn_gnn_forward(params, x, edge_attr, batch, num_graphs):
    N, D = x.shape
    G = num_graphs
    LANES = 128

    # exact reproduction of the module's two edge reinterpretations:
    edge_index = edge_attr.reshape(2, -1)          # conv / aggregation edges
    edge_sequence = edge_attr.reshape(-1, 2).T     # RNN edge ordering
    E = edge_index.shape[1]

    S, C, Mscaled, P, Gsrc, Gdst = build_graph_operators(
        edge_index, edge_sequence, batch, N, G)

    # Fold BatchNorm (eval) into ChebConv weights/bias: scale = gamma/sqrt(var+eps)
    scale = params["bn_gamma"] * lax.rsqrt(params["bn_var"] + 1e-5)
    w0f = params["cheb_w0"] * scale
    w1f = params["cheb_w1"] * scale
    bf = (params["cheb_b"] - params["bn_mean"]) * scale + params["bn_beta"]

    H1 = w0f.shape[1]
    RH = params["gru_whh"].shape[0]
    H2 = params["gat_w"].shape[1]
    assert H1 <= LANES and 3 * RH <= LANES and H2 <= LANES and N <= LANES

    # ---------------- packed STRUCTURE slab (one DMA) ----------------
    Wc = max(D, N, E)
    off_x = 0
    off_s = _align8(N)
    off_c = off_s + _align8(N)
    off_gs = off_c + _align8(N)
    off_gd = off_gs + _align8(E)
    off_p = off_gd + _align8(E)
    off_m = off_p + _align8(G)
    n_struct = off_m + _align8(N)

    struct = jnp.zeros((n_struct, Wc), jnp.float32)
    struct = struct.at[off_x:off_x + N, 0:D].set(x)
    struct = struct.at[off_s:off_s + N, 0:N].set(S)
    struct = struct.at[off_c:off_c + N, 0:N].set(C)
    struct = struct.at[off_gs:off_gs + E, 0:N].set(Gsrc)
    struct = struct.at[off_gd:off_gd + E, 0:N].set(Gdst)
    struct = struct.at[off_p:off_p + G, 0:N].set(P)
    struct = struct.at[off_m:off_m + N, 0:E].set(Mscaled)

    # ---------------- packed PARAMETER slab (one DMA) ----------------
    off_w0 = 0
    off_w1 = off_w0 + _align8(D)
    off_wih_s = off_w1 + _align8(D)
    off_wih_d = off_wih_s + _align8(H1)
    off_whh = off_wih_d + _align8(H1)
    off_gw_h = off_whh + _align8(RH)
    off_gw_a = off_gw_h + _align8(H1)
    off_wl = off_gw_a + _align8(RH)
    off_b = off_wl + _align8(H2)
    n_par = off_b + 8

    pslab = jnp.zeros((n_par, LANES), jnp.float32)
    pslab = pslab.at[off_w0:off_w0 + D, 0:H1].set(w0f)
    pslab = pslab.at[off_w1:off_w1 + D, 0:H1].set(w1f)
    pslab = pslab.at[off_wih_s:off_wih_s + H1, 0:3 * RH].set(params["gru_wih"][:H1])
    pslab = pslab.at[off_wih_d:off_wih_d + H1, 0:3 * RH].set(params["gru_wih"][H1:])
    pslab = pslab.at[off_whh:off_whh + RH, 0:3 * RH].set(params["gru_whh"])
    pslab = pslab.at[off_gw_h:off_gw_h + H1, 0:H2].set(params["gat_w"][:H1])
    pslab = pslab.at[off_gw_a:off_gw_a + RH, 0:H2].set(params["gat_w"][H1:])
    pslab = pslab.at[off_wl:off_wl + H2, 0:1].set(params["lin_w"])       # lane-dense head
    pslab = pslab.at[off_b + 0, 0:H1].set(bf[0])
    pslab = pslab.at[off_b + 1, 0:3 * RH].set(params["gru_bih"][0])
    pslab = pslab.at[off_b + 2, 0:3 * RH].set(params["gru_bhh"][0])
    pslab = pslab.at[off_b + 3, 0:H2].set(params["gat_asrc"][0])
    pslab = pslab.at[off_b + 4, 0:H2].set(params["gat_adst"][0])
    pslab = pslab.at[off_b + 5, 0:H2].set(params["gat_b"][0])
    pslab = pslab.at[off_b + 6, 0:1].set(params["lin_b"][0])

    E_pad = _align8(E)

    # ----------------------- the fused kernel -----------------------
    def kernel(st_ref, p_ref, out_ref, rnn_ref):
        # parameter slab: static slices out of one resident VMEM block.
        w0 = p_ref[off_w0:off_w0 + D, 0:H1]
        w1 = p_ref[off_w1:off_w1 + D, 0:H1]
        wih_s = p_ref[off_wih_s:off_wih_s + H1, 0:3 * RH]
        wih_d = p_ref[off_wih_d:off_wih_d + H1, 0:3 * RH]
        whh = p_ref[off_whh:off_whh + RH, 0:3 * RH]
        gw_h = p_ref[off_gw_h:off_gw_h + H1, 0:H2]
        gw_a = p_ref[off_gw_a:off_gw_a + RH, 0:H2]
        wl = p_ref[off_wl:off_wl + H2, :]
        b_all = p_ref[off_b:off_b + 8, :]                 # one (8,128) tile, all biases
        b_cheb = b_all[0:1, 0:H1]
        bih = b_all[1:2, 0:3 * RH]
        bhh = b_all[2:3, 0:3 * RH]
        att_s = b_all[3:4, 0:H2]
        att_d = b_all[4:5, 0:H2]
        gat_b = b_all[5:6, 0:H2]
        bl = b_all[6:7, :]

        # structure slab.
        xin = st_ref[off_x:off_x + N, 0:D]
        s_mat = st_ref[off_s:off_s + N, 0:N]
        c_mat = st_ref[off_c:off_c + N, 0:N]
        gsrc = st_ref[off_gs:off_gs + E, 0:N]
        gdst = st_ref[off_gd:off_gd + E, 0:N]
        p_mat = st_ref[off_p:off_p + G, 0:N]
        m_mat = st_ref[off_m:off_m + N, 0:E]

        # --- ChebConv(K=2, lambda_max=2) + BN(eval, folded) + ReLU ---
        sx = jnp.dot(s_mat, xin, preferred_element_type=jnp.float32)
        h = (jnp.dot(xin, w0, preferred_element_type=jnp.float32)
             + jnp.dot(sx, w1, preferred_element_type=jnp.float32) + b_cheb)
        h = jnp.maximum(h, 0.0)                                          # [N, H1]

        # --- GRU input projection, hoisted out of the recurrence ---
        h_src = jnp.dot(gsrc, h, preferred_element_type=jnp.float32)     # [E, H1]
        h_dst = jnp.dot(gdst, h, preferred_element_type=jnp.float32)     # [E, H1]
        gi_all = (jnp.dot(h_src, wih_s, preferred_element_type=jnp.float32)
                  + jnp.dot(h_dst, wih_d, preferred_element_type=jnp.float32)
                  + bih)                                                 # [E, 3*RH]

        # --- GRU recurrence (PyTorch gate order r,z,n), fully unrolled.
        #     Merged r|z sigmoid = one EUP issue; h_t written to a tiny VMEM
        #     scratch so the aggregation is a single post-loop MXU matmul. ---
        h_t = jnp.zeros((1, RH), jnp.float32)
        for t in range(E):
            gi = gi_all[t:t + 1, :]
            gh = jnp.dot(h_t, whh, preferred_element_type=jnp.float32) + bhh
            rz = jax.nn.sigmoid(gi[:, 0:2 * RH] + gh[:, 0:2 * RH])
            r = rz[:, 0:RH]
            z = rz[:, RH:2 * RH]
            n = jnp.tanh(gi[:, 2 * RH:3 * RH] + r * gh[:, 2 * RH:3 * RH])
            h_t = (1.0 - z) * n + z * h_t
            rnn_ref[t:t + 1, :] = h_t

        # --- edge -> node mean aggregation: one matmul (1/cnt folded in M) ---
        agg = jnp.dot(m_mat, rnn_ref[0:E, :], preferred_element_type=jnp.float32)

        # --- GATConv (1 head) + ReLU ---
        hg = (jnp.dot(h, gw_h, preferred_element_type=jnp.float32)
              + jnp.dot(agg, gw_a, preferred_element_type=jnp.float32))  # [N, H2]
        al_s = jnp.sum(hg * att_s, axis=-1, keepdims=True)               # [N, 1]
        al_d = jnp.sum(hg * att_d, axis=-1, keepdims=True)               # [N, 1]
        logits = al_s.T + al_d               # logits[i, j] = a_src.(Wx_j) + a_dst.(Wx_i)
        logits = jnp.where(logits >= 0.0, logits, 0.2 * logits)          # leaky_relu(0.2)
        # unmasked row max upper-bounds the edge max; C==0 kills non-edges below,
        # so no pre-exp -1e30 masking is needed.
        mx = jnp.max(logits, axis=1, keepdims=True)
        wexp = c_mat * jnp.exp(logits - mx)  # duplicate edges weighted by their count
        attn = wexp / jnp.sum(wexp, axis=1, keepdims=True)
        gat = jnp.dot(attn, hg, preferred_element_type=jnp.float32) + gat_b
        gat = jnp.maximum(gat, 0.0)                                      # [N, H2]

        # --- global_mean_pool + Linear(H2 -> 1), lane-dense padded store ---
        pooled = jnp.dot(p_mat, gat, preferred_element_type=jnp.float32)  # [G, H2]
        out_ref[...] = (jnp.dot(pooled, wl, preferred_element_type=jnp.float32)
                        + bl)                                             # [G, 128]

    out_pad = pl.pallas_call(
        kernel,
        out_shape=jax.ShapeDtypeStruct((G, LANES), jnp.float32),
        in_specs=[_VMEM(), _VMEM()],
        out_specs=_VMEM(),
        scratch_shapes=[pltpu.VMEM((E_pad, RH), jnp.float32)],
        compiler_params=pltpu.CompilerParams(vmem_limit_bytes=32 * 1024 * 1024),
    )(struct, pslab)
    return out_pad[:, :1]


if __name__ == "__main__":
    key = jax.random.PRNGKey(0)
    k_x, k_e, k_p = jax.random.split(key, 3)

    N, INPUT_DIM, H1, H2, RH = 16, 8, 16, 32, 16
    E, NUM_GRAPHS = 12, 2

    x = jax.random.normal(k_x, (N, INPUT_DIM), jnp.float32)
    # edge_attr holds node indices; forward reinterprets it as edge_index / edge_sequence
    edge_attr = jax.random.randint(k_e, (2 * E,), 0, N, dtype=jnp.int32)
    batch = jnp.concatenate([jnp.zeros(N // 2, jnp.int32),
                             jnp.ones(N // 2, jnp.int32)])

    params = init_params(k_p, INPUT_DIM, H1, H2, RH)

    out = sequential_rnn_gnn_forward(params, x, edge_attr, batch, NUM_GRAPHS)
    out = jax.block_until_ready(out)

    assert out.shape == (NUM_GRAPHS, 1)
    assert bool(jnp.all(jnp.isfinite(out)))
    print("KERNEL_OK")
</pallas_src>

<mosaic_0001>
module attributes {stable_mosaic.version = 11 : i64} {
  func.func @kernel(%arg0: memref<104x16xf32, #tpu.memory_space<vmem>>, %arg1: memref<136x128xf32, #tpu.memory_space<vmem>>, %arg2: memref<2x128xf32, #tpu.memory_space<vmem>>, %arg3: memref<16x16xf32, #tpu.memory_space<vmem>>) attributes {dimension_semantics = [], scalar_prefetch = 0 : i64, scratch_operands = 1 : i64, tpu.core_type = #tpu.core_type<tc>} {
    %c0 = arith.constant 0 : index
    %c0_0 = arith.constant 0 : index
    %0 = vector.load %arg1[%c0, %c0_0] : memref<136x128xf32, #tpu.memory_space<vmem>>, vector<8x16xf32>
    %c8 = arith.constant 8 : index
    %c0_1 = arith.constant 0 : index
    %1 = vector.load %arg1[%c8, %c0_1] : memref<136x128xf32, #tpu.memory_space<vmem>>, vector<8x16xf32>
    %c16 = arith.constant 16 : index
    %c0_2 = arith.constant 0 : index
    %2 = vector.load %arg1[%c16, %c0_2] : memref<136x128xf32, #tpu.memory_space<vmem>>, vector<16x48xf32>
    %c32 = arith.constant 32 : index
    %c0_3 = arith.constant 0 : index
    %3 = vector.load %arg1[%c32, %c0_3] : memref<136x128xf32, #tpu.memory_space<vmem>>, vector<16x48xf32>
    %c48 = arith.constant 48 : index
    %c0_4 = arith.constant 0 : index
    %4 = vector.load %arg1[%c48, %c0_4] : memref<136x128xf32, #tpu.memory_space<vmem>>, vector<16x48xf32>
    %c64 = arith.constant 64 : index
    %c0_5 = arith.constant 0 : index
    %5 = vector.load %arg1[%c64, %c0_5] : memref<136x128xf32, #tpu.memory_space<vmem>>, vector<16x32xf32>
    %c80 = arith.constant 80 : index
    %c0_6 = arith.constant 0 : index
    %6 = vector.load %arg1[%c80, %c0_6] : memref<136x128xf32, #tpu.memory_space<vmem>>, vector<16x32xf32>
    %c96 = arith.constant 96 : index
    %c0_7 = arith.constant 0 : index
    %7 = vector.load %arg1[%c96, %c0_7] : memref<136x128xf32, #tpu.memory_space<vmem>>, vector<32x128xf32>
    %c128 = arith.constant 128 : index
    %c0_8 = arith.constant 0 : index
    %8 = vector.load %arg1[%c128, %c0_8] : memref<136x128xf32, #tpu.memory_space<vmem>>, vector<8x128xf32>
    %9 = vector.extract_strided_slice %8 {offsets = [0, 0], sizes = [1, 16], strides = [1, 1]} : vector<8x128xf32> to vector<1x16xf32>
    %10 = vector.extract_strided_slice %8 {offsets = [1, 0], sizes = [1, 48], strides = [1, 1]} : vector<8x128xf32> to vector<1x48xf32>
    %11 = vector.extract_strided_slice %8 {offsets = [2, 0], sizes = [1, 48], strides = [1, 1]} : vector<8x128xf32> to vector<1x48xf32>
    %12 = vector.extract_strided_slice %8 {offsets = [3, 0], sizes = [1, 32], strides = [1, 1]} : vector<8x128xf32> to vector<1x32xf32>
    %13 = vector.extract_strided_slice %8 {offsets = [4, 0], sizes = [1, 32], strides = [1, 1]} : vector<8x128xf32> to vector<1x32xf32>
    %14 = vector.extract_strided_slice %8 {offsets = [5, 0], sizes = [1, 32], strides = [1, 1]} : vector<8x128xf32> to vector<1x32xf32>
    %15 = vector.extract_strided_slice %8 {offsets = [6, 0], sizes = [1, 128], strides = [1, 1]} : vector<8x128xf32> to vector<1x128xf32>
    %c0_9 = arith.constant 0 : index
    %c0_10 = arith.constant 0 : index
    %16 = vector.load %arg0[%c0_9, %c0_10] : memref<104x16xf32, #tpu.memory_space<vmem>>, vector<16x8xf32>
    %c16_11 = arith.constant 16 : index
    %c0_12 = arith.constant 0 : index
    %17 = vector.load %arg0[%c16_11, %c0_12] : memref<104x16xf32, #tpu.memory_space<vmem>>, vector<16x16xf32>
    %c32_13 = arith.constant 32 : index
    %c0_14 = arith.constant 0 : index
    %18 = vector.load %arg0[%c32_13, %c0_14] : memref<104x16xf32, #tpu.memory_space<vmem>>, vector<16x16xf32>
    %c48_15 = arith.constant 48 : index
    %c0_16 = arith.constant 0 : index
    %19 = vector.load %arg0[%c48_15, %c0_16] : memref<104x16xf32, #tpu.memory_space<vmem>>, vector<12x16xf32>
    %c64_17 = arith.constant 64 : index
    %c0_18 = arith.constant 0 : index
    %20 = vector.load %arg0[%c64_17, %c0_18] : memref<104x16xf32, #tpu.memory_space<vmem>>, vector<12x16xf32>
    %c80_19 = arith.constant 80 : index
    %c0_20 = arith.constant 0 : index
    %21 = vector.load %arg0[%c80_19, %c0_20] : memref<104x16xf32, #tpu.memory_space<vmem>>, vector<2x16xf32>
    %c88 = arith.constant 88 : index
    %c0_21 = arith.constant 0 : index
    %22 = vector.load %arg0[%c88, %c0_21] : memref<104x16xf32, #tpu.memory_space<vmem>>, vector<16x12xf32>
    %cst = arith.constant dense<0.000000e+00> : vector<16x8xf32>
    %23 = tpu.matmul %17, %16, %cst {dimension_numbers = #tpu.dot_dimension_numbers<[1], [0], [0], [1], [0, 0, 1, 1], [], []>} : vector<16x16xf32>, vector<16x8xf32>, vector<16x8xf32> -> vector<16x8xf32>
    %cst_22 = arith.constant dense<0.000000e+00> : vector<16x16xf32>
    %24 = tpu.matmul %16, %0, %cst_22 {dimension_numbers = #tpu.dot_dimension_numbers<[1], [0], [0], [1], [0, 0, 1, 1], [], []>} : vector<16x8xf32>, vector<8x16xf32>, vector<16x16xf32> -> vector<16x16xf32>
    %cst_23 = arith.constant dense<0.000000e+00> : vector<16x16xf32>
    %25 = tpu.matmul %23, %1, %cst_23 {dimension_numbers = #tpu.dot_dimension_numbers<[1], [0], [0], [1], [0, 0, 1, 1], [], []>} : vector<16x8xf32>, vector<8x16xf32>, vector<16x16xf32> -> vector<16x16xf32>
    %26 = arith.addf %24, %25 : vector<16x16xf32>
    %27 = vector.broadcast %9 : vector<1x16xf32> to vector<16x16xf32>
    %28 = arith.addf %26, %27 : vector<16x16xf32>
    %cst_24 = arith.constant 0.000000e+00 : f32
    %29 = vector.broadcast %cst_24 : f32 to vector<16x16xf32>
    %30 = arith.maximumf %28, %29 : vector<16x16xf32>
    %cst_25 = arith.constant dense<0.000000e+00> : vector<12x16xf32>
    %31 = tpu.matmul %19, %30, %cst_25 {dimension_numbers = #tpu.dot_dimension_numbers<[1], [0], [0], [1], [0, 0, 1, 1], [], []>} : vector<12x16xf32>, vector<16x16xf32>, vector<12x16xf32> -> vector<12x16xf32>
    %cst_26 = arith.constant dense<0.000000e+00> : vector<12x16xf32>
    %32 = tpu.matmul %20, %30, %cst_26 {dimension_numbers = #tpu.dot_dimension_numbers<[1], [0], [0], [1], [0, 0, 1, 1], [], []>} : vector<12x16xf32>, vector<16x16xf32>, vector<12x16xf32> -> vector<12x16xf32>
    %cst_27 = arith.constant dense<0.000000e+00> : vector<12x48xf32>
    %33 = tpu.matmul %31, %2, %cst_27 {dimension_numbers = #tpu.dot_dimension_numbers<[1], [0], [0], [1], [0, 0, 1, 1], [], []>} : vector<12x16xf32>, vector<16x48xf32>, vector<12x48xf32> -> vector<12x48xf32>
    %cst_28 = arith.constant dense<0.000000e+00> : vector<12x48xf32>
    %34 = tpu.matmul %32, %3, %cst_28 {dimension_numbers = #tpu.dot_dimension_numbers<[1], [0], [0], [1], [0, 0, 1, 1], [], []>} : vector<12x16xf32>, vector<16x48xf32>, vector<12x48xf32> -> vector<12x48xf32>
    %35 = arith.addf %33, %34 : vector<12x48xf32>
    %36 = vector.broadcast %10 : vector<1x48xf32> to vector<12x48xf32>
    %37 = arith.addf %35, %36 : vector<12x48xf32>
    %cst_29 = arith.constant 0.000000e+00 : f32
    %38 = vector.broadcast %cst_29 : f32 to vector<1x16xf32>
    %39 = vector.extract_strided_slice %37 {offsets = [0, 0], sizes = [1, 48], strides = [1, 1]} : vector<12x48xf32> to vector<1x48xf32>
    %cst_30 = arith.constant dense<0.000000e+00> : vector<1x48xf32>
    %40 = tpu.matmul %38, %4, %cst_30 {dimension_numbers = #tpu.dot_dimension_numbers<[1], [0], [0], [1], [0, 0, 1, 1], [], []>} : vector<1x16xf32>, vector<16x48xf32>, vector<1x48xf32> -> vector<1x48xf32>
    %41 = arith.addf %40, %11 : vector<1x48xf32>
    %42 = vector.extract_strided_slice %39 {offsets = [0, 0], sizes = [1, 32], strides = [1, 1]} : vector<1x48xf32> to vector<1x32xf32>
    %43 = vector.extract_strided_slice %41 {offsets = [0, 0], sizes = [1, 32], strides = [1, 1]} : vector<1x48xf32> to vector<1x32xf32>
    %44 = arith.addf %42, %43 : vector<1x32xf32>
    %45 = arith.negf %44 : vector<1x32xf32>
    %46 = math.exp %45 : vector<1x32xf32>
    %cst_31 = arith.constant 1.000000e+00 : f32
    %47 = vector.broadcast %cst_31 : f32 to vector<1x32xf32>
    %48 = arith.addf %47, %46 : vector<1x32xf32>
    %49 = arith.divf %47, %48 : vector<1x32xf32>
    %50 = vector.extract_strided_slice %49 {offsets = [0, 0], sizes = [1, 16], strides = [1, 1]} : vector<1x32xf32> to vector<1x16xf32>
    %51 = vector.extract_strided_slice %49 {offsets = [0, 16], sizes = [1, 16], strides = [1, 1]} : vector<1x32xf32> to vector<1x16xf32>
    %52 = vector.extract_strided_slice %39 {offsets = [0, 32], sizes = [1, 16], strides = [1, 1]} : vector<1x48xf32> to vector<1x16xf32>
    %53 = vector.extract_strided_slice %41 {offsets = [0, 32], sizes = [1, 16], strides = [1, 1]} : vector<1x48xf32> to vector<1x16xf32>
    %54 = arith.mulf %50, %53 : vector<1x16xf32>
    %55 = arith.addf %52, %54 : vector<1x16xf32>
    %56 = math.tanh %55 : vector<1x16xf32>
    %cst_32 = arith.constant 1.000000e+00 : f32
    %57 = vector.broadcast %cst_32 : f32 to vector<1x16xf32>
    %58 = arith.subf %57, %51 : vector<1x16xf32>
    %59 = arith.mulf %58, %56 : vector<1x16xf32>
    %60 = arith.mulf %51, %38 : vector<1x16xf32>
    %61 = arith.addf %59, %60 : vector<1x16xf32>
    %c0_33 = arith.constant 0 : index
    %c0_34 = arith.constant 0 : index
    %62 = vector.load %arg3[%c0_33, %c0_34] : memref<16x16xf32, #tpu.memory_space<vmem>>, vector<1x16xf32>
    tpu.vector_store %arg3[%c0_33, %c0_34], %61 {strides = array<i32>} : memref<16x16xf32, #tpu.memory_space<vmem>>, vector<1x16xf32>,
    %63 = vector.extract_strided_slice %37 {offsets = [1, 0], sizes = [1, 48], strides = [1, 1]} : vector<12x48xf32> to vector<1x48xf32>
    %cst_35 = arith.constant dense<0.000000e+00> : vector<1x48xf32>
    %64 = tpu.matmul %61, %4, %cst_35 {dimension_numbers = #tpu.dot_dimension_numbers<[1], [0], [0], [1], [0, 0, 1, 1], [], []>} : vector<1x16xf32>, vector<16x48xf32>, vector<1x48xf32> -> vector<1x48xf32>
    %65 = arith.addf %64, %11 : vector<1x48xf32>
    %66 = vector.extract_strided_slice %63 {offsets = [0, 0], sizes = [1, 32], strides = [1, 1]} : vector<1x48xf32> to vector<1x32xf32>
    %67 = vector.extract_strided_slice %65 {offsets = [0, 0], sizes = [1, 32], strides = [1, 1]} : vector<1x48xf32> to vector<1x32xf32>
    %68 = arith.addf %66, %67 : vector<1x32xf32>
    %69 = arith.negf %68 : vector<1x32xf32>
    %70 = math.exp %69 : vector<1x32xf32>
    %cst_36 = arith.constant 1.000000e+00 : f32
    %71 = vector.broadcast %cst_36 : f32 to vector<1x32xf32>
    %72 = arith.addf %71, %70 : vector<1x32xf32>
    %73 = arith.divf %71, %72 : vector<1x32xf32>
    %74 = vector.extract_strided_slice %73 {offsets = [0, 0], sizes = [1, 16], strides = [1, 1]} : vector<1x32xf32> to vector<1x16xf32>
    %75 = vector.extract_strided_slice %73 {offsets = [0, 16], sizes = [1, 16], strides = [1, 1]} : vector<1x32xf32> to vector<1x16xf32>
    %76 = vector.extract_strided_slice %63 {offsets = [0, 32], sizes = [1, 16], strides = [1, 1]} : vector<1x48xf32> to vector<1x16xf32>
    %77 = vector.extract_strided_slice %65 {offsets = [0, 32], sizes = [1, 16], strides = [1, 1]} : vector<1x48xf32> to vector<1x16xf32>
    %78 = arith.mulf %74, %77 : vector<1x16xf32>
    %79 = arith.addf %76, %78 : vector<1x16xf32>
    %80 = math.tanh %79 : vector<1x16xf32>
    %cst_37 = arith.constant 1.000000e+00 : f32
    %81 = vector.broadcast %cst_37 : f32 to vector<1x16xf32>
    %82 = arith.subf %81, %75 : vector<1x16xf32>
    %83 = arith.mulf %82, %80 : vector<1x16xf32>
    %84 = arith.mulf %75, %61 : vector<1x16xf32>
    %85 = arith.addf %83, %84 : vector<1x16xf32>
    %c1 = arith.constant 1 : index
    %c0_38 = arith.constant 0 : index
    %86 = vector.load %arg3[%c1, %c0_38] : memref<16x16xf32, #tpu.memory_space<vmem>>, vector<1x16xf32>
    tpu.vector_store %arg3[%c1, %c0_38], %85 {strides = array<i32>} : memref<16x16xf32, #tpu.memory_space<vmem>>, vector<1x16xf32>,
    %87 = vector.extract_strided_slice %37 {offsets = [2, 0], sizes = [1, 48], strides = [1, 1]} : vector<12x48xf32> to vector<1x48xf32>
    %cst_39 = arith.constant dense<0.000000e+00> : vector<1x48xf32>
    %88 = tpu.matmul %85, %4, %cst_39 {dimension_numbers = #tpu.dot_dimension_numbers<[1], [0], [0], [1], [0, 0, 1, 1], [], []>} : vector<1x16xf32>, vector<16x48xf32>, vector<1x48xf32> -> vector<1x48xf32>
    %89 = arith.addf %88, %11 : vector<1x48xf32>
    %90 = vector.extract_strided_slice %87 {offsets = [0, 0], sizes = [1, 32], strides = [1, 1]} : vector<1x48xf32> to vector<1x32xf32>
    %91 = vector.extract_strided_slice %89 {offsets = [0, 0], sizes = [1, 32], strides = [1, 1]} : vector<1x48xf32> to vector<1x32xf32>
    %92 = arith.addf %90, %91 : vector<1x32xf32>
    %93 = arith.negf %92 : vector<1x32xf32>
    %94 = math.exp %93 : vector<1x32xf32>
    %cst_40 = arith.constant 1.000000e+00 : f32
    %95 = vector.broadcast %cst_40 : f32 to vector<1x32xf32>
    %96 = arith.addf %95, %94 : vector<1x32xf32>
    %97 = arith.divf %95, %96 : vector<1x32xf32>
    %98 = vector.extract_strided_slice %97 {offsets = [0, 0], sizes = [1, 16], strides = [1, 1]} : vector<1x32xf32> to vector<1x16xf32>
    %99 = vector.extract_strided_slice %97 {offsets = [0, 16], sizes = [1, 16], strides = [1, 1]} : vector<1x32xf32> to vector<1x16xf32>
    %100 = vector.extract_strided_slice %87 {offsets = [0, 32], sizes = [1, 16], strides = [1, 1]} : vector<1x48xf32> to vector<1x16xf32>
    %101 = vector.extract_strided_slice %89 {offsets = [0, 32], sizes = [1, 16], strides = [1, 1]} : vector<1x48xf32> to vector<1x16xf32>
    %102 = arith.mulf %98, %101 : vector<1x16xf32>
    %103 = arith.addf %100, %102 : vector<1x16xf32>
    %104 = math.tanh %103 : vector<1x16xf32>
    %cst_41 = arith.constant 1.000000e+00 : f32
    %105 = vector.broadcast %cst_41 : f32 to vector<1x16xf32>
    %106 = arith.subf %105, %99 : vector<1x16xf32>
    %107 = arith.mulf %106, %104 : vector<1x16xf32>
    %108 = arith.mulf %99, %85 : vector<1x16xf32>
    %109 = arith.addf %107, %108 : vector<1x16xf32>
    %c2 = arith.constant 2 : index
    %c0_42 = arith.constant 0 : index
    %110 = vector.load %arg3[%c2, %c0_42] : memref<16x16xf32, #tpu.memory_space<vmem>>, vector<1x16xf32>
    tpu.vector_store %arg3[%c2, %c0_42], %109 {strides = array<i32>} : memref<16x16xf32, #tpu.memory_space<vmem>>, vector<1x16xf32>,
    %111 = vector.extract_strided_slice %37 {offsets = [3, 0], sizes = [1, 48], strides = [1, 1]} : vector<12x48xf32> to vector<1x48xf32>
    %cst_43 = arith.constant dense<0.000000e+00> : vector<1x48xf32>
    %112 = tpu.matmul %109, %4, %cst_43 {dimension_numbers = #tpu.dot_dimension_numbers<[1], [0], [0], [1], [0, 0, 1, 1], [], []>} : vector<1x16xf32>, vector<16x48xf32>, vector<1x48xf32> -> vector<1x48xf32>
    %113 = arith.addf %112, %11 : vector<1x48xf32>
    %114 = vector.extract_strided_slice %111 {offsets = [0, 0], sizes = [1, 32], strides = [1, 1]} : vector<1x48xf32> to vector<1x32xf32>
    %115 = vector.extract_strided_slice %113 {offsets = [0, 0], sizes = [1, 32], strides = [1, 1]} : vector<1x48xf32> to vector<1x32xf32>
    %116 = arith.addf %114, %115 : vector<1x32xf32>
    %117 = arith.negf %116 : vector<1x32xf32>
    %118 = math.exp %117 : vector<1x32xf32>
    %cst_44 = arith.constant 1.000000e+00 : f32
    %119 = vector.broadcast %cst_44 : f32 to vector<1x32xf32>
    %120 = arith.addf %119, %118 : vector<1x32xf32>
    %121 = arith.divf %119, %120 : vector<1x32xf32>
    %122 = vector.extract_strided_slice %121 {offsets = [0, 0], sizes = [1, 16], strides = [1, 1]} : vector<1x32xf32> to vector<1x16xf32>
    %123 = vector.extract_strided_slice %121 {offsets = [0, 16], sizes = [1, 16], strides = [1, 1]} : vector<1x32xf32> to vector<1x16xf32>
    %124 = vector.extract_strided_slice %111 {offsets = [0, 32], sizes = [1, 16], strides = [1, 1]} : vector<1x48xf32> to vector<1x16xf32>
    %125 = vector.extract_strided_slice %113 {offsets = [0, 32], sizes = [1, 16], strides = [1, 1]} : vector<1x48xf32> to vector<1x16xf32>
    %126 = arith.mulf %122, %125 : vector<1x16xf32>
    %127 = arith.addf %124, %126 : vector<1x16xf32>
    %128 = math.tanh %127 : vector<1x16xf32>
    %cst_45 = arith.constant 1.000000e+00 : f32
    %129 = vector.broadcast %cst_45 : f32 to vector<1x16xf32>
    %130 = arith.subf %129, %123 : vector<1x16xf32>
    %131 = arith.mulf %130, %128 : vector<1x16xf32>
    %132 = arith.mulf %123, %109 : vector<1x16xf32>
    %133 = arith.addf %131, %132 : vector<1x16xf32>
    %c3 = arith.constant 3 : index
    %c0_46 = arith.constant 0 : index
    %134 = vector.load %arg3[%c3, %c0_46] : memref<16x16xf32, #tpu.memory_space<vmem>>, vector<1x16xf32>
    tpu.vector_store %arg3[%c3, %c0_46], %133 {strides = array<i32>} : memref<16x16xf32, #tpu.memory_space<vmem>>, vector<1x16xf32>,
    %135 = vector.extract_strided_slice %37 {offsets = [4, 0], sizes = [1, 48], strides = [1, 1]} : vector<12x48xf32> to vector<1x48xf32>
    %cst_47 = arith.constant dense<0.000000e+00> : vector<1x48xf32>
    %136 = tpu.matmul %133, %4, %cst_47 {dimension_numbers = #tpu.dot_dimension_numbers<[1], [0], [0], [1], [0, 0, 1, 1], [], []>} : vector<1x16xf32>, vector<16x48xf32>, vector<1x48xf32> -> vector<1x48xf32>
    %137 = arith.addf %136, %11 : vector<1x48xf32>
    %138 = vector.extract_strided_slice %135 {offsets = [0, 0], sizes = [1, 32], strides = [1, 1]} : vector<1x48xf32> to vector<1x32xf32>
    %139 = vector.extract_strided_slice %137 {offsets = [0, 0], sizes = [1, 32], strides = [1, 1]} : vector<1x48xf32> to vector<1x32xf32>
    %140 = arith.addf %138, %139 : vector<1x32xf32>
    %141 = arith.negf %140 : vector<1x32xf32>
    %142 = math.exp %141 : vector<1x32xf32>
    %cst_48 = arith.constant 1.000000e+00 : f32
    %143 = vector.broadcast %cst_48 : f32 to vector<1x32xf32>
    %144 = arith.addf %143, %142 : vector<1x32xf32>
    %145 = arith.divf %143, %144 : vector<1x32xf32>
    %146 = vector.extract_strided_slice %145 {offsets = [0, 0], sizes = [1, 16], strides = [1, 1]} : vector<1x32xf32> to vector<1x16xf32>
    %147 = vector.extract_strided_slice %145 {offsets = [0, 16], sizes = [1, 16], strides = [1, 1]} : vector<1x32xf32> to vector<1x16xf32>
    %148 = vector.extract_strided_slice %135 {offsets = [0, 32], sizes = [1, 16], strides = [1, 1]} : vector<1x48xf32> to vector<1x16xf32>
    %149 = vector.extract_strided_slice %137 {offsets = [0, 32], sizes = [1, 16], strides = [1, 1]} : vector<1x48xf32> to vector<1x16xf32>
    %150 = arith.mulf %146, %149 : vector<1x16xf32>
    %151 = arith.addf %148, %150 : vector<1x16xf32>
    %152 = math.tanh %151 : vector<1x16xf32>
    %cst_49 = arith.constant 1.000000e+00 : f32
    %153 = vector.broadcast %cst_49 : f32 to vector<1x16xf32>
    %154 = arith.subf %153, %147 : vector<1x16xf32>
    %155 = arith.mulf %154, %152 : vector<1x16xf32>
    %156 = arith.mulf %147, %133 : vector<1x16xf32>
    %157 = arith.addf %155, %156 : vector<1x16xf32>
    %c4 = arith.constant 4 : index
    %c0_50 = arith.constant 0 : index
    %158 = vector.load %arg3[%c4, %c0_50] : memref<16x16xf32, #tpu.memory_space<vmem>>, vector<1x16xf32>
    tpu.vector_store %arg3[%c4, %c0_50], %157 {strides = array<i32>} : memref<16x16xf32, #tpu.memory_space<vmem>>, vector<1x16xf32>,
    %159 = vector.extract_strided_slice %37 {offsets = [5, 0], sizes = [1, 48], strides = [1, 1]} : vector<12x48xf32> to vector<1x48xf32>
    %cst_51 = arith.constant dense<0.000000e+00> : vector<1x48xf32>
    %160 = tpu.matmul %157, %4, %cst_51 {dimension_numbers = #tpu.dot_dimension_numbers<[1], [0], [0], [1], [0, 0, 1, 1], [], []>} : vector<1x16xf32>, vector<16x48xf32>, vector<1x48xf32> -> vector<1x48xf32>
    %161 = arith.addf %160, %11 : vector<1x48xf32>
    %162 = vector.extract_strided_slice %159 {offsets = [0, 0], sizes = [1, 32], strides = [1, 1]} : vector<1x48xf32> to vector<1x32xf32>
    %163 = vector.extract_strided_slice %161 {offsets = [0, 0], sizes = [1, 32], strides = [1, 1]} : vector<1x48xf32> to vector<1x32xf32>
    %164 = arith.addf %162, %163 : vector<1x32xf32>
    %165 = arith.negf %164 : vector<1x32xf32>
    %166 = math.exp %165 : vector<1x32xf32>
    %cst_52 = arith.constant 1.000000e+00 : f32
    %167 = vector.broadcast %cst_52 : f32 to vector<1x32xf32>
    %168 = arith.addf %167, %166 : vector<1x32xf32>
    %169 = arith.divf %167, %168 : vector<1x32xf32>
    %170 = vector.extract_strided_slice %169 {offsets = [0, 0], sizes = [1, 16], strides = [1, 1]} : vector<1x32xf32> to vector<1x16xf32>
    %171 = vector.extract_strided_slice %169 {offsets = [0, 16], sizes = [1, 16], strides = [1, 1]} : vector<1x32xf32> to vector<1x16xf32>
    %172 = vector.extract_strided_slice %159 {offsets = [0, 32], sizes = [1, 16], strides = [1, 1]} : vector<1x48xf32> to vector<1x16xf32>
    %173 = vector.extract_strided_slice %161 {offsets = [0, 32], sizes = [1, 16], strides = [1, 1]} : vector<1x48xf32> to vector<1x16xf32>
    %174 = arith.mulf %170, %173 : vector<1x16xf32>
    %175 = arith.addf %172, %174 : vector<1x16xf32>
    %176 = math.tanh %175 : vector<1x16xf32>
    %cst_53 = arith.constant 1.000000e+00 : f32
    %177 = vector.broadcast %cst_53 : f32 to vector<1x16xf32>
    %178 = arith.subf %177, %171 : vector<1x16xf32>
    %179 = arith.mulf %178, %176 : vector<1x16xf32>
    %180 = arith.mulf %171, %157 : vector<1x16xf32>
    %181 = arith.addf %179, %180 : vector<1x16xf32>
    %c5 = arith.constant 5 : index
    %c0_54 = arith.constant 0 : index
    %182 = vector.load %arg3[%c5, %c0_54] : memref<16x16xf32, #tpu.memory_space<vmem>>, vector<1x16xf32>
    tpu.vector_store %arg3[%c5, %c0_54], %181 {strides = array<i32>} : memref<16x16xf32, #tpu.memory_space<vmem>>, vector<1x16xf32>,
    %183 = vector.extract_strided_slice %37 {offsets = [6, 0], sizes = [1, 48], strides = [1, 1]} : vector<12x48xf32> to vector<1x48xf32>
    %cst_55 = arith.constant dense<0.000000e+00> : vector<1x48xf32>
    %184 = tpu.matmul %181, %4, %cst_55 {dimension_numbers = #tpu.dot_dimension_numbers<[1], [0], [0], [1], [0, 0, 1, 1], [], []>} : vector<1x16xf32>, vector<16x48xf32>, vector<1x48xf32> -> vector<1x48xf32>
    %185 = arith.addf %184, %11 : vector<1x48xf32>
    %186 = vector.extract_strided_slice %183 {offsets = [0, 0], sizes = [1, 32], strides = [1, 1]} : vector<1x48xf32> to vector<1x32xf32>
    %187 = vector.extract_strided_slice %185 {offsets = [0, 0], sizes = [1, 32], strides = [1, 1]} : vector<1x48xf32> to vector<1x32xf32>
    %188 = arith.addf %186, %187 : vector<1x32xf32>
    %189 = arith.negf %188 : vector<1x32xf32>
    %190 = math.exp %189 : vector<1x32xf32>
    %cst_56 = arith.constant 1.000000e+00 : f32
    %191 = vector.broadcast %cst_56 : f32 to vector<1x32xf32>
    %192 = arith.addf %191, %190 : vector<1x32xf32>
    %193 = arith.divf %191, %192 : vector<1x32xf32>
    %194 = vector.extract_strided_slice %193 {offsets = [0, 0], sizes = [1, 16], strides = [1, 1]} : vector<1x32xf32> to vector<1x16xf32>
    %195 = vector.extract_strided_slice %193 {offsets = [0, 16], sizes = [1, 16], strides = [1, 1]} : vector<1x32xf32> to vector<1x16xf32>
    %196 = vector.extract_strided_slice %183 {offsets = [0, 32], sizes = [1, 16], strides = [1, 1]} : vector<1x48xf32> to vector<1x16xf32>
    %197 = vector.extract_strided_slice %185 {offsets = [0, 32], sizes = [1, 16], strides = [1, 1]} : vector<1x48xf32> to vector<1x16xf32>
    %198 = arith.mulf %194, %197 : vector<1x16xf32>
    %199 = arith.addf %196, %198 : vector<1x16xf32>
    %200 = math.tanh %199 : vector<1x16xf32>
    %cst_57 = arith.constant 1.000000e+00 : f32
    %201 = vector.broadcast %cst_57 : f32 to vector<1x16xf32>
    %202 = arith.subf %201, %195 : vector<1x16xf32>
    %203 = arith.mulf %202, %200 : vector<1x16xf32>
    %204 = arith.mulf %195, %181 : vector<1x16xf32>
    %205 = arith.addf %203, %204 : vector<1x16xf32>
    %c6 = arith.constant 6 : index
    %c0_58 = arith.constant 0 : index
    %206 = vector.load %arg3[%c6, %c0_58] : memref<16x16xf32, #tpu.memory_space<vmem>>, vector<1x16xf32>
    tpu.vector_store %arg3[%c6, %c0_58], %205 {strides = array<i32>} : memref<16x16xf32, #tpu.memory_space<vmem>>, vector<1x16xf32>,
    %207 = vector.extract_strided_slice %37 {offsets = [7, 0], sizes = [1, 48], strides = [1, 1]} : vector<12x48xf32> to vector<1x48xf32>
    %cst_59 = arith.constant dense<0.000000e+00> : vector<1x48xf32>
    %208 = tpu.matmul %205, %4, %cst_59 {dimension_numbers = #tpu.dot_dimension_numbers<[1], [0], [0], [1], [0, 0, 1, 1], [], []>} : vector<1x16xf32>, vector<16x48xf32>, vector<1x48xf32> -> vector<1x48xf32>
    %209 = arith.addf %208, %11 : vector<1x48xf32>
    %210 = vector.extract_strided_slice %207 {offsets = [0, 0], sizes = [1, 32], strides = [1, 1]} : vector<1x48xf32> to vector<1x32xf32>
    %211 = vector.extract_strided_slice %209 {offsets = [0, 0], sizes = [1, 32], strides = [1, 1]} : vector<1x48xf32> to vector<1x32xf32>
    %212 = arith.addf %210, %211 : vector<1x32xf32>
    %213 = arith.negf %212 : vector<1x32xf32>
    %214 = math.exp %213 : vector<1x32xf32>
    %cst_60 = arith.constant 1.000000e+00 : f32
    %215 = vector.broadcast %cst_60 : f32 to vector<1x32xf32>
    %216 = arith.addf %215, %214 : vector<1x32xf32>
    %217 = arith.divf %215, %216 : vector<1x32xf32>
    %218 = vector.extract_strided_slice %217 {offsets = [0, 0], sizes = [1, 16], strides = [1, 1]} : vector<1x32xf32> to vector<1x16xf32>
    %219 = vector.extract_strided_slice %217 {offsets = [0, 16], sizes = [1, 16], strides = [1, 1]} : vector<1x32xf32> to vector<1x16xf32>
    %220 = vector.extract_strided_slice %207 {offsets = [0, 32], sizes = [1, 16], strides = [1, 1]} : vector<1x48xf32> to vector<1x16xf32>
    %221 = vector.extract_strided_slice %209 {offsets = [0, 32], sizes = [1, 16], strides = [1, 1]} : vector<1x48xf32> to vector<1x16xf32>
    %222 = arith.mulf %218, %221 : vector<1x16xf32>
    %223 = arith.addf %220, %222 : vector<1x16xf32>
    %224 = math.tanh %223 : vector<1x16xf32>
    %cst_61 = arith.constant 1.000000e+00 : f32
    %225 = vector.broadcast %cst_61 : f32 to vector<1x16xf32>
    %226 = arith.subf %225, %219 : vector<1x16xf32>
    %227 = arith.mulf %226, %224 : vector<1x16xf32>
    %228 = arith.mulf %219, %205 : vector<1x16xf32>
    %229 = arith.addf %227, %228 : vector<1x16xf32>
    %c7 = arith.constant 7 : index
    %c0_62 = arith.constant 0 : index
    %230 = vector.load %arg3[%c7, %c0_62] : memref<16x16xf32, #tpu.memory_space<vmem>>, vector<1x16xf32>
    tpu.vector_store %arg3[%c7, %c0_62], %229 {strides = array<i32>} : memref<16x16xf32, #tpu.memory_space<vmem>>, vector<1x16xf32>,
    %231 = vector.extract_strided_slice %37 {offsets = [8, 0], sizes = [1, 48], strides = [1, 1]} : vector<12x48xf32> to vector<1x48xf32>
    %cst_63 = arith.constant dense<0.000000e+00> : vector<1x48xf32>
    %232 = tpu.matmul %229, %4, %cst_63 {dimension_numbers = #tpu.dot_dimension_numbers<[1], [0], [0], [1], [0, 0, 1, 1], [], []>} : vector<1x16xf32>, vector<16x48xf32>, vector<1x48xf32> -> vector<1x48xf32>
    %233 = arith.addf %232, %11 : vector<1x48xf32>
    %234 = vector.extract_strided_slice %231 {offsets = [0, 0], sizes = [1, 32], strides = [1, 1]} : vector<1x48xf32> to vector<1x32xf32>
    %235 = vector.extract_strided_slice %233 {offsets = [0, 0], sizes = [1, 32], strides = [1, 1]} : vector<1x48xf32> to vector<1x32xf32>
    %236 = arith.addf %234, %235 : vector<1x32xf32>
    %237 = arith.negf %236 : vector<1x32xf32>
    %238 = math.exp %237 : vector<1x32xf32>
    %cst_64 = arith.constant 1.000000e+00 : f32
    %239 = vector.broadcast %cst_64 : f32 to vector<1x32xf32>
    %240 = arith.addf %239, %238 : vector<1x32xf32>
    %241 = arith.divf %239, %240 : vector<1x32xf32>
    %242 = vector.extract_strided_slice %241 {offsets = [0, 0], sizes = [1, 16], strides = [1, 1]} : vector<1x32xf32> to vector<1x16xf32>
    %243 = vector.extract_strided_slice %241 {offsets = [0, 16], sizes = [1, 16], strides = [1, 1]} : vector<1x32xf32> to vector<1x16xf32>
    %244 = vector.extract_strided_slice %231 {offsets = [0, 32], sizes = [1, 16], strides = [1, 1]} : vector<1x48xf32> to vector<1x16xf32>
    %245 = vector.extract_strided_slice %233 {offsets = [0, 32], sizes = [1, 16], strides = [1, 1]} : vector<1x48xf32> to vector<1x16xf32>
    %246 = arith.mulf %242, %245 : vector<1x16xf32>
    %247 = arith.addf %244, %246 : vector<1x16xf32>
    %248 = math.tanh %247 : vector<1x16xf32>
    %cst_65 = arith.constant 1.000000e+00 : f32
    %249 = vector.broadcast %cst_65 : f32 to vector<1x16xf32>
    %250 = arith.subf %249, %243 : vector<1x16xf32>
    %251 = arith.mulf %250, %248 : vector<1x16xf32>
    %252 = arith.mulf %243, %229 : vector<1x16xf32>
    %253 = arith.addf %251, %252 : vector<1x16xf32>
    %c8_66 = arith.constant 8 : index
    %c0_67 = arith.constant 0 : index
    %254 = vector.load %arg3[%c8_66, %c0_67] : memref<16x16xf32, #tpu.memory_space<vmem>>, vector<1x16xf32>
    tpu.vector_store %arg3[%c8_66, %c0_67], %253 {strides = array<i32>} : memref<16x16xf32, #tpu.memory_space<vmem>>, vector<1x16xf32>,
    %255 = vector.extract_strided_slice %37 {offsets = [9, 0], sizes = [1, 48], strides = [1, 1]} : vector<12x48xf32> to vector<1x48xf32>
    %cst_68 = arith.constant dense<0.000000e+00> : vector<1x48xf32>
    %256 = tpu.matmul %253, %4, %cst_68 {dimension_numbers = #tpu.dot_dimension_numbers<[1], [0], [0], [1], [0, 0, 1, 1], [], []>} : vector<1x16xf32>, vector<16x48xf32>, vector<1x48xf32> -> vector<1x48xf32>
    %257 = arith.addf %256, %11 : vector<1x48xf32>
    %258 = vector.extract_strided_slice %255 {offsets = [0, 0], sizes = [1, 32], strides = [1, 1]} : vector<1x48xf32> to vector<1x32xf32>
    %259 = vector.extract_strided_slice %257 {offsets = [0, 0], sizes = [1, 32], strides = [1, 1]} : vector<1x48xf32> to vector<1x32xf32>
    %260 = arith.addf %258, %259 : vector<1x32xf32>
    %261 = arith.negf %260 : vector<1x32xf32>
    %262 = math.exp %261 : vector<1x32xf32>
    %cst_69 = arith.constant 1.000000e+00 : f32
    %263 = vector.broadcast %cst_69 : f32 to vector<1x32xf32>
    %264 = arith.addf %263, %262 : vector<1x32xf32>
    %265 = arith.divf %263, %264 : vector<1x32xf32>
    %266 = vector.extract_strided_slice %265 {offsets = [0, 0], sizes = [1, 16], strides = [1, 1]} : vector<1x32xf32> to vector<1x16xf32>
    %267 = vector.extract_strided_slice %265 {offsets = [0, 16], sizes = [1, 16], strides = [1, 1]} : vector<1x32xf32> to vector<1x16xf32>
    %268 = vector.extract_strided_slice %255 {offsets = [0, 32], sizes = [1, 16], strides = [1, 1]} : vector<1x48xf32> to vector<1x16xf32>
    %269 = vector.extract_strided_slice %257 {offsets = [0, 32], sizes = [1, 16], strides = [1, 1]} : vector<1x48xf32> to vector<1x16xf32>
    %270 = arith.mulf %266, %269 : vector<1x16xf32>
    %271 = arith.addf %268, %270 : vector<1x16xf32>
    %272 = math.tanh %271 : vector<1x16xf32>
    %cst_70 = arith.constant 1.000000e+00 : f32
    %273 = vector.broadcast %cst_70 : f32 to vector<1x16xf32>
    %274 = arith.subf %273, %267 : vector<1x16xf32>
    %275 = arith.mulf %274, %272 : vector<1x16xf32>
    %276 = arith.mulf %267, %253 : vector<1x16xf32>
    %277 = arith.addf %275, %276 : vector<1x16xf32>
    %c9 = arith.constant 9 : index
    %c0_71 = arith.constant 0 : index
    %278 = vector.load %arg3[%c9, %c0_71] : memref<16x16xf32, #tpu.memory_space<vmem>>, vector<1x16xf32>
    tpu.vector_store %arg3[%c9, %c0_71], %277 {strides = array<i32>} : memref<16x16xf32, #tpu.memory_space<vmem>>, vector<1x16xf32>,
    %279 = vector.extract_strided_slice %37 {offsets = [10, 0], sizes = [1, 48], strides = [1, 1]} : vector<12x48xf32> to vector<1x48xf32>
    %cst_72 = arith.constant dense<0.000000e+00> : vector<1x48xf32>
    %280 = tpu.matmul %277, %4, %cst_72 {dimension_numbers = #tpu.dot_dimension_numbers<[1], [0], [0], [1], [0, 0, 1, 1], [], []>} : vector<1x16xf32>, vector<16x48xf32>, vector<1x48xf32> -> vector<1x48xf32>
    %281 = arith.addf %280, %11 : vector<1x48xf32>
    %282 = vector.extract_strided_slice %279 {offsets = [0, 0], sizes = [1, 32], strides = [1, 1]} : vector<1x48xf32> to vector<1x32xf32>
    %283 = vector.extract_strided_slice %281 {offsets = [0, 0], sizes = [1, 32], strides = [1, 1]} : vector<1x48xf32> to vector<1x32xf32>
    %284 = arith.addf %282, %283 : vector<1x32xf32>
    %285 = arith.negf %284 : vector<1x32xf32>
    %286 = math.exp %285 : vector<1x32xf32>
    %cst_73 = arith.constant 1.000000e+00 : f32
    %287 = vector.broadcast %cst_73 : f32 to vector<1x32xf32>
    %288 = arith.addf %287, %286 : vector<1x32xf32>
    %289 = arith.divf %287, %288 : vector<1x32xf32>
    %290 = vector.extract_strided_slice %289 {offsets = [0, 0], sizes = [1, 16], strides = [1, 1]} : vector<1x32xf32> to vector<1x16xf32>
    %291 = vector.extract_strided_slice %289 {offsets = [0, 16], sizes = [1, 16], strides = [1, 1]} : vector<1x32xf32> to vector<1x16xf32>
    %292 = vector.extract_strided_slice %279 {offsets = [0, 32], sizes = [1, 16], strides = [1, 1]} : vector<1x48xf32> to vector<1x16xf32>
    %293 = vector.extract_strided_slice %281 {offsets = [0, 32], sizes = [1, 16], strides = [1, 1]} : vector<1x48xf32> to vector<1x16xf32>
    %294 = arith.mulf %290, %293 : vector<1x16xf32>
    %295 = arith.addf %292, %294 : vector<1x16xf32>
    %296 = math.tanh %295 : vector<1x16xf32>
    %cst_74 = arith.constant 1.000000e+00 : f32
    %297 = vector.broadcast %cst_74 : f32 to vector<1x16xf32>
    %298 = arith.subf %297, %291 : vector<1x16xf32>
    %299 = arith.mulf %298, %296 : vector<1x16xf32>
    %300 = arith.mulf %291, %277 : vector<1x16xf32>
    %301 = arith.addf %299, %300 : vector<1x16xf32>
    %c10 = arith.constant 10 : index
    %c0_75 = arith.constant 0 : index
    %302 = vector.load %arg3[%c10, %c0_75] : memref<16x16xf32, #tpu.memory_space<vmem>>, vector<1x16xf32>
    tpu.vector_store %arg3[%c10, %c0_75], %301 {strides = array<i32>} : memref<16x16xf32, #tpu.memory_space<vmem>>, vector<1x16xf32>,
    %303 = vector.extract_strided_slice %37 {offsets = [11, 0], sizes = [1, 48], strides = [1, 1]} : vector<12x48xf32> to vector<1x48xf32>
    %cst_76 = arith.constant dense<0.000000e+00> : vector<1x48xf32>
    %304 = tpu.matmul %301, %4, %cst_76 {dimension_numbers = #tpu.dot_dimension_numbers<[1], [0], [0], [1], [0, 0, 1, 1], [], []>} : vector<1x16xf32>, vector<16x48xf32>, vector<1x48xf32> -> vector<1x48xf32>
    %305 = arith.addf %304, %11 : vector<1x48xf32>
    %306 = vector.extract_strided_slice %303 {offsets = [0, 0], sizes = [1, 32], strides = [1, 1]} : vector<1x48xf32> to vector<1x32xf32>
    %307 = vector.extract_strided_slice %305 {offsets = [0, 0], sizes = [1, 32], strides = [1, 1]} : vector<1x48xf32> to vector<1x32xf32>
    %308 = arith.addf %306, %307 : vector<1x32xf32>
    %309 = arith.negf %308 : vector<1x32xf32>
    %310 = math.exp %309 : vector<1x32xf32>
    %cst_77 = arith.constant 1.000000e+00 : f32
    %311 = vector.broadcast %cst_77 : f32 to vector<1x32xf32>
    %312 = arith.addf %311, %310 : vector<1x32xf32>
    %313 = arith.divf %311, %312 : vector<1x32xf32>
    %314 = vector.extract_strided_slice %313 {offsets = [0, 0], sizes = [1, 16], strides = [1, 1]} : vector<1x32xf32> to vector<1x16xf32>
    %315 = vector.extract_strided_slice %313 {offsets = [0, 16], sizes = [1, 16], strides = [1, 1]} : vector<1x32xf32> to vector<1x16xf32>
    %316 = vector.extract_strided_slice %303 {offsets = [0, 32], sizes = [1, 16], strides = [1, 1]} : vector<1x48xf32> to vector<1x16xf32>
    %317 = vector.extract_strided_slice %305 {offsets = [0, 32], sizes = [1, 16], strides = [1, 1]} : vector<1x48xf32> to vector<1x16xf32>
    %318 = arith.mulf %314, %317 : vector<1x16xf32>
    %319 = arith.addf %316, %318 : vector<1x16xf32>
    %320 = math.tanh %319 : vector<1x16xf32>
    %cst_78 = arith.constant 1.000000e+00 : f32
    %321 = vector.broadcast %cst_78 : f32 to vector<1x16xf32>
    %322 = arith.subf %321, %315 : vector<1x16xf32>
    %323 = arith.mulf %322, %320 : vector<1x16xf32>
    %324 = arith.mulf %315, %301 : vector<1x16xf32>
    %325 = arith.addf %323, %324 : vector<1x16xf32>
    %c11 = arith.constant 11 : index
    %c0_79 = arith.constant 0 : index
    %326 = vector.load %arg3[%c11, %c0_79] : memref<16x16xf32, #tpu.memory_space<vmem>>, vector<1x16xf32>
    tpu.vector_store %arg3[%c11, %c0_79], %325 {strides = array<i32>} : memref<16x16xf32, #tpu.memory_space<vmem>>, vector<1x16xf32>,
    %c0_80 = arith.constant 0 : index
    %c0_81 = arith.constant 0 : index
    %327 = vector.load %arg3[%c0_80, %c0_81] : memref<16x16xf32, #tpu.memory_space<vmem>>, vector<12x16xf32>
    %cst_82 = arith.constant dense<0.000000e+00> : vector<16x16xf32>
    %328 = tpu.matmul %22, %327, %cst_82 {dimension_numbers = #tpu.dot_dimension_numbers<[1], [0], [0], [1], [0, 0, 1, 1], [], []>} : vector<16x12xf32>, vector<12x16xf32>, vector<16x16xf32> -> vector<16x16xf32>
    %cst_83 = arith.constant dense<0.000000e+00> : vector<16x32xf32>
    %329 = tpu.matmul %30, %5, %cst_83 {dimension_numbers = #tpu.dot_dimension_numbers<[1], [0], [0], [1], [0, 0, 1, 1], [], []>} : vector<16x16xf32>, vector<16x32xf32>, vector<16x32xf32> -> vector<16x32xf32>
    %cst_84 = arith.constant dense<0.000000e+00> : vector<16x32xf32>
    %330 = tpu.matmul %328, %6, %cst_84 {dimension_numbers = #tpu.dot_dimension_numbers<[1], [0], [0], [1], [0, 0, 1, 1], [], []>} : vector<16x16xf32>, vector<16x32xf32>, vector<16x32xf32> -> vector<16x32xf32>
    %331 = arith.addf %329, %330 : vector<16x32xf32>
    %332 = vector.broadcast %12 : vector<1x32xf32> to vector<16x32xf32>
    %333 = arith.mulf %331, %332 : vector<16x32xf32>
    %cst_85 = arith.constant dense<0.000000e+00> : vector<16xf32>
    %334 = vector.multi_reduction <add>, %333, %cst_85 [1] : vector<16x32xf32> to vector<16xf32>
    %335 = vector.shape_cast %334 : vector<16xf32> to vector<16x1xf32>
    %336 = vector.broadcast %13 : vector<1x32xf32> to vector<16x32xf32>
    %337 = arith.mulf %331, %336 : vector<16x32xf32>
    %cst_86 = arith.constant dense<0.000000e+00> : vector<16xf32>
    %338 = vector.multi_reduction <add>, %337, %cst_86 [1] : vector<16x32xf32> to vector<16xf32>
    %339 = vector.shape_cast %338 : vector<16xf32> to vector<16x1xf32>
    %340 = tpu.transpose %335, [1, 0] : vector<16x1xf32> -> vector<1x16xf32>
    %341 = vector.broadcast %340 : vector<1x16xf32> to vector<16x16xf32>
    %342 = vector.broadcast %339 : vector<16x1xf32> to vector<16x16xf32>
    %343 = arith.addf %341, %342 : vector<16x16xf32>
    %cst_87 = arith.constant 0.000000e+00 : f32
    %344 = vector.broadcast %cst_87 : f32 to vector<16x16xf32>
    %345 = arith.cmpf oge, %343, %344 : vector<16x16xf32>
    %cst_88 = arith.constant 2.000000e-01 : f32
    %346 = vector.broadcast %cst_88 : f32 to vector<16x16xf32>
    %347 = arith.mulf %346, %343 : vector<16x16xf32>
    %348 = arith.select %345, %343, %347 : vector<16x16xi1>, vector<16x16xf32>
    %cst_89 = arith.constant dense<0xFF800000> : vector<16xf32>
    %349 = vector.multi_reduction <maximumf>, %348, %cst_89 [1] : vector<16x16xf32> to vector<16xf32>
    %350 = vector.shape_cast %349 : vector<16xf32> to vector<16x1xf32>
    %351 = vector.broadcast %350 : vector<16x1xf32> to vector<16x16xf32>
    %352 = arith.subf %348, %351 : vector<16x16xf32>
    %353 = math.exp %352 : vector<16x16xf32>
    %354 = arith.mulf %18, %353 : vector<16x16xf32>
    %cst_90 = arith.constant dense<0.000000e+00> : vector<16xf32>
    %355 = vector.multi_reduction <add>, %354, %cst_90 [1] : vector<16x16xf32> to vector<16xf32>
    %356 = vector.shape_cast %355 : vector<16xf32> to vector<16x1xf32>
    %357 = vector.broadcast %356 : vector<16x1xf32> to vector<16x16xf32>
    %358 = arith.divf %354, %357 : vector<16x16xf32>
    %cst_91 = arith.constant dense<0.000000e+00> : vector<16x32xf32>
    %359 = tpu.matmul %358, %331, %cst_91 {dimension_numbers = #tpu.dot_dimension_numbers<[1], [0], [0], [1], [0, 0, 1, 1], [], []>} : vector<16x16xf32>, vector<16x32xf32>, vector<16x32xf32> -> vector<16x32xf32>
    %360 = vector.broadcast %14 : vector<1x32xf32> to vector<16x32xf32>
    %361 = arith.addf %359, %360 : vector<16x32xf32>
    %cst_92 = arith.constant 0.000000e+00 : f32
    %362 = vector.broadcast %cst_92 : f32 to vector<16x32xf32>
    %363 = arith.maximumf %361, %362 : vector<16x32xf32>
    %cst_93 = arith.constant dense<0.000000e+00> : vector<2x32xf32>
    %364 = tpu.matmul %21, %363, %cst_93 {dimension_numbers = #tpu.dot_dimension_numbers<[1], [0], [0], [1], [0, 0, 1, 1], [], []>} : vector<2x16xf32>, vector<16x32xf32>, vector<2x32xf32> -> vector<2x32xf32>
    %cst_94 = arith.constant dense<0.000000e+00> : vector<2x128xf32>
    %365 = tpu.matmul %364, %7, %cst_94 {dimension_numbers = #tpu.dot_dimension_numbers<[1], [0], [0], [1], [0, 0, 1, 1], [], []>} : vector<2x32xf32>, vector<32x128xf32>, vector<2x128xf32> -> vector<2x128xf32>
    %366 = vector.broadcast %15 : vector<1x128xf32> to vector<2x128xf32>
    %367 = arith.addf %365, %366 : vector<2x128xf32>
    %c0_95 = arith.constant 0 : index
    %c0_96 = arith.constant 0 : index
    %368 = vector.load %arg2[%c0_95, %c0_96] : memref<2x128xf32, #tpu.memory_space<vmem>>, vector<2x128xf32>
    tpu.vector_store %arg2[%c0_95, %c0_96], %367 {strides = array<i32>} : memref<2x128xf32, #tpu.memory_space<vmem>>, vector<2x128xf32>,
    return
  }
}

</mosaic_0001>

<bundles_post_ra>
// kernel: sequential_rnn_gnn_forward.1
= control target key start
LH: loop header
LB: loop body
LE: loop exit
PB: predicated region body
PF: predicated region fallthrough
CT: control target
= control target key end

     0   :  { %vm41_vm0 = vcmask 130048   ;;  %vm123_vm1 = vcmask 64512   ;;  %v286_v13 = vlaneseq  ;;  %v3011_v35 = vmov 0.0|0.0   ;;  %s3014_s15 = smov 96   ;;  %s3015_s16 = smov 32   ;;  %s3404_s0 = inlined_call_operand.vmem [shape: f32[104,16], index: 0, kind: input, shape index: {}]   ;;  %s3405_s1 = inlined_call_operand.vmem [shape: f32[136,128], index: 1, kind: input, shape index: {}]   ;;  %s3406_s2 = inlined_call_operand.vmem [shape: f32[2,128], index: 2, kind: output, shape index: {}]  }
   0x1   :  { %v28_v0 = vld [vmem:[%s3404_s0] sm:$0xff]  ;;  %v29_v1 = vld [vmem:[%s3404_s0 + $0x8] sm:$0xff]  ;;  %v30_v2 = vld [vmem:[%s3404_s0 + $0x10] sm:$0xff]  ;;  %vm3012_vm2 = vmmov 0   ;;  %v3013_v36 = vmov 0.0   ;;  %s3016_s17 = smov 112  }
   0x2   :  { %v2834_v3 = vpack.c.bf16 %v29_v1, %v28_v0  ;;  %2663 = vmatprep.mubr.msk.f32.mxu0 %vm41_vm0, %v30_v2  ;;  %v12_v4 = vld [vmem:[%s3405_s1 + $0x8] sm:$0xff]  ;;  %v31_v5 = vld [vmem:[%s3404_s0 + $0x18] sm:$0xff]  ;;  %v11_v6 = vld [vmem:[%s3405_s1] sm:$0xff]  ;;  %2673 = vmatprep.mubr.msk.f32.mxu1 %vm123_vm1, %v28_v0  ;;  %v3061_v14 = vshrl.u32 %v286_v13, 7  ;;  %vm730_vm3 = vcmask 122880   ;;  %vm838_vm4 = vcmask 123905  }
   0x3   :  { %2671 = vmatprep.subr.mxu1 %v11_v6  ;;  %v36_v11 = vld [vmem:[%s3404_s0 + $0x40] sm:$0xff]  ;;  %v34_v12 = vld [vmem:[%s3404_s0 + $0x30] sm:$0xff]  ;;  %v16_v26 = vld [vmem:[%s3405_s1 + $0x28] sm:$0xff]  ;;  %vm1060_vm5 = vcmask 125955   ;;  %vm1282_vm6 = vcmask 128005   ;;  %vm1504_vm7 = vcmask 130055  }
   0x4   :  { %2835 = vmatprep.subr.bf16.mxu0 %v2834_v3  ;;  %2672 = vmatpush3.msra.mxu1 %v11_v6  ;;  %v288_v15 = vsub.s32 0, %v3061_v14  ;;  %v27_v16 = vld [vmem:[%s3405_s1 + $0x80] sm:$0xff]  ;;  %v17_v29 = vld [vmem:[%s3405_s1 + $0x30] sm:$0xff]  ;;  %v18_v30 = vld [vmem:[%s3405_s1 + $0x38] sm:$0xff]  ;;  %v620_v48 = vsub.s32 1, %v3061_v14  ;;  %vm949_vm8 = vcmask 124930  }
   0x5   :  { %2837 = vmatpush3.bf16.msra.mxu0 %v2834_v3  ;;  %2674 = vmatmul.mubr.msk.f32.vlgmr.msra.gmra.mrb[0].mxu1 %vm123_vm1, %v29_v1  ;;  %v15_v25 = vld [vmem:[%s3405_s1 + $0x20] sm:$0xff]  ;;  %v37_v32 = vld [vmem:[%s3404_s0 + $0x48] sm:$0xf]  ;;  %v35_v33 = vld [vmem:[%s3404_s0 + $0x38] sm:$0xf]  ;;  %v3097_v34 = vpack.c.bf16 %v18_v30, %v17_v29  ;;  %v3117_v42 = vrot.slane %v27_v16, 2 }
   0x6   :  { %2666 = vmatprep.subr.mxu0 %v12_v4  ;;  %2687 = vmatprep.mubr.msk.f32.mxu1 %vm41_vm0, %v36_v11  ;;  %v289_v17 = vrot.slane %v27_v16, %v288_v15  ;;  %v2846_v31 = vpack.c.bf16 %v16_v26, %v15_v25  ;;  %v13_v37 = vld [vmem:[%s3405_s1 + $0x10] sm:$0xff]  ;;  %v14_v38 = vld [vmem:[%s3405_s1 + $0x18] sm:$0xff]  ;;  %v621_v49 = vrot.slane %v27_v16, %v620_v48  ;;  %vm1942_vm9 = vcmask 97280  }
   0x7   :  { %v2850_v39 = vpack.c.bf16 %v14_v38, %v13_v37  ;;  %vm1171_vm10 = vcmask 126980   ;;  %vm1393_vm11 = vcmask 129030   ;;  %vm1949_vm12 = vcmask 1043456  }
   0x8   :  { %2664 = vmatmul.mubr.msk.f32.vlgmr.msra.gmra.mrb[0].mxu0 %vm41_vm0, %v31_v5  ;;  %vm3017_vm13 = vmmov 1   ;;  %vm2196_vm15 = vcmask 261120  }
   0x9   :  { %2667 = vmatpush3.msra.mxu0 %v12_v4  ;;  %vm2891_vm14 = vmpackc.low %vm1949_vm12, %vm3017_vm13 }
  0xd8   :  { %v2675_v9 = vpop.f32.mrb[0].mxu1 }
  0xd9   :  { %v277_v10 = vpop.f32.mrb[1].mxu1 }
  0xdb   :  { %v2665_v7 = vpop.f32.mrb[0].mxu0 }
  0xdc   :  { %v114_v8 = vpop.f32.mrb[1].mxu0 }
  0xdd   :  { %2668 = vmatprep.mubr.msk.f32.mxu0 %vm123_vm1, %v114_v8 }
  0xde   :  { %2669 = vmatmul.mubr.msk.f32.vlgmr.msra.gmra.mrb[2].mxu0 %vm123_vm1, %v2665_v7 }
  0xdf   :  { %2680 = vmatprep.mubr.msk.f32.mxu0 %vm41_vm0, %v34_v12 }
 0x1b1   :  { %v2670_v18 = vpop.f32.mrb[2].mxu0 }
 0x1b2   :  { %v283_v19 = vadd.f32 %v2675_v9, %v2670_v18  ;;  %v196_v20 = vpop.f32.mrb[3].mxu0 }
 0x1b3   :  { %v278_v21 = vadd.f32 %v277_v10, %v196_v20 }
 0x1b4   :  { %v3069_v22 = vadd.f32 %v289_v17, %v283_v19 }
 0x1b5   :  { %v3071_v23 = vadd.f32 %v289_v17, %v278_v21 }
 0x1b6   :  { %v293_v24 = vmax.f32 %v3069_v22, 0.0 }
 0x1b7   :  { %v292_v27 = vmax.f32 %v3071_v23, 0.0 }
 0x1b9   :  { %v2838_v28 = vpack.c.bf16 %v293_v24, %v292_v27 }
 0x1bb   :  { %2839 = vmatprep.subr.bf16.mxu0 %v2838_v28  ;;  %2843 = vmatprep.subr.bf16.mxu1 %v2838_v28 }
 0x1bc   :  { %2841 = vmatpush3.bf16.msra.mxu0 %v2838_v28  ;;  %2845 = vmatpush3.bf16.msra.mxu1 %v2838_v28 }
 0x1bd   :  { %2854 = vmatprep.subr.bf16.mxu1 %v3011_v35  ;;  %2847 = vmatprep.subr.bf16.mxu0 %v2846_v31 }
 0x1bf   :  { %2688 = vmatmul.mubr.msk.f32.vlgmr.msra.gmra.mrb[2].mxu1 %vm41_vm0, %v37_v32  ;;  %2681 = vmatmul.mubr.msk.f32.vlgmr.msra.gmra.mrb[4].mxu0 %vm41_vm0, %v35_v33 }
 0x1c0   :  { %2856 = vmatpush3.bf16.msra.mxu1 %v3097_v34  ;;  %2708 = vmatprep.mubr.msk.f32.mxu1 %vm3012_vm2, %v3013_v36 }
 0x1c1   :  { %2849 = vmatpush3.bf16.msra.mxu0 %v2846_v31  ;;  %2857 = vmatprep.subr.bf16.mxu1 %v3011_v35 }
 0x1c2   :  { %2851 = vmatprep.subr.bf16.mxu0 %v2850_v39 }
 0x1c3   :  { %2709 = vmatmul.mubr.f32.vlgmr.msra.gmra.mrb[4].mxu1 %v3013_v36 }
 0x1c4   :  { %2859 = vmatpush3.bf16.msra.mxu1 %v3097_v34  ;;  %2715 = vmatprep.mubr.msk.f32.mxu1 %vm3012_vm2, %v3013_v36 }
 0x1c5   :  { %2863 = vmatprep.subr.bf16.mxu1 %v3011_v35 }
 0x292   :  { %v2689_v40 = vpop.f32.mrb[2].mxu1  ;;  %v2682_v41 = vpop.f32.mrb[4].mxu0 }
 0x293   :  { %v447_v43 = vpop.f32.mrb[3].mxu1  ;;  %v366_v44 = vpop.f32.mrb[5].mxu0 }
 0x294   :  { %2694 = vmatprep.mubr.msk.f32.mxu0 %vm41_vm0, %v447_v43 }
 0x295   :  { %2695 = vmatmul.mubr.msk.f32.vlgmr.msra.gmra.mrb[6].mxu0 %vm41_vm0, %v2689_v40 }
 0x296   :  { %2853 = vmatpush3.bf16.msra.mxu0 %v2850_v39  ;;  %2701 = vmatprep.mubr.msk.f32.mxu0 %vm41_vm0, %v366_v44  ;;  %v696_v45 = vpop.f32.mrb[4].mxu1 }
 0x297   :  { %v697_v46 = vadd.f32 %v696_v45, %v3117_v42  ;;  %v2710_v47 = vpop.f32.mrb[5].mxu1  ;;  %2860 = vmatprep.subr.bf16.mxu0 %v3011_v35 }
 0x299   :  { %708 = vrot.lane.b32.xlu0 %v697_v46, %s3014_s15 }
 0x29d   :  { %2702 = vmatmul.mubr.msk.f32.vlgmr.msra.gmra.mrb[6].mxu0 %vm41_vm0, %v2682_v41 }
 0x29e   :  { %2862 = vmatpush3.bf16.msra.mxu0 %v3097_v34  ;;  %2722 = vmatprep.mubr.msk.f32.mxu0 %vm3012_vm2, %v3013_v36 }
 0x29f   :  { %2866 = vmatprep.subr.bf16.mxu0 %v3011_v35 }
 0x30b   :  { %v709_v58 = vpop.permute.xlu0 %708 }
 0x370   :  { %v2703_v50 = vpop.f32.mrb[6].mxu0 }
 0x371   :  { %v3131_v51 = vadd.f32 %v2703_v50, %v621_v49  ;;  %v609_v52 = vpop.f32.mrb[7].mxu0 }
 0x372   :  { %v3133_v53 = vadd.f32 %v621_v49, %v609_v52 }
 0x374   :  { %v700_v54 = vadd.f32 %v697_v46, %v3133_v53 }
 0x376   :  { %v2539_v55 = vmul.f32 -1.442695, %v700_v54 }
 0x378   :  { %2930 = vpow2.f32 %v2539_v55 }
 0x382   :  { %v2931_v56 = vpop.eup %2930 }
 0x383   :  { %v704_v57 = vadd.f32 1.0, %v2931_v56 }
 0x385   :  { %2932 = vrcp.f32 %v704_v57 }
 0x38f   :  { %v2933_v59 = vpop.eup %2932 }
 0x390   :  { %v711_v60 = vmul.f32 %v2933_v59, %v709_v58  ;;  %v718_v0 = vsub.f32 1.0, %v2933_v59  ;;  %v724_v2 = vmul.f32 0.0, %v2933_v59 }
 0x392   :  { %713 = vrot.lane.b32.xlu0 %v711_v60, %s3015_s16 }
 0x404   :  { %v714_v61 = vpop.permute.xlu0 %713 }
 0x405   :  { %v716_v62 = vadd.f32 %v714_v61, %v3133_v53 }
 0x407   :  { %2934 = vtanh.f32 %v716_v62 }
 0x411   :  { %v2935_v63 = vpop.eup %2934 }
 0x412   :  { %720 = vrot.lane.b32.xlu1 %v2935_v63, %s3016_s17 }
 0x484   :  { %v721_v1 = vpop.permute.xlu1 %720 }
 0x485   :  { %v723_v3 = vmul.f32 %v721_v1, %v718_v0 }
 0x487   :  { %v725_v4 = vadd.f32 %v724_v2, %v723_v3 }
 0x489   :  { %727 = vrot.lane.b32.xlu1 %v725_v4, %s3016_s17  ;;  %v830_v25 = vrot.slane %v725_v4, 7 }
 0x4fb   :  { %v728_v5 = vpop.permute.xlu1 %727 }
 0x4fc   :  { %731 = vst.msk [vmem:[#allocation2] sm:$0x1] %vm730_vm3, %v728_v5  ;;  %2716 = vmatmul.mubr.msk.f32.vlgmr.msra.gmra.mrb[6].mxu1 %vm41_vm0, %v728_v5 }
 0x4fd   :  { %2865 = vmatpush3.bf16.msra.mxu1 %v3097_v34  ;;  %2729 = vmatprep.mubr.msk.f32.mxu1 %vm3012_vm2, %v3013_v36 }
 0x4fe   :  { %2869 = vmatprep.subr.bf16.mxu1 %v3011_v35 }
 0x5cf   :  { %v800_v6 = vpop.f32.mrb[6].mxu1 }
 0x5d0   :  { %v801_v7 = vadd.f32 %v800_v6, %v3117_v42  ;;  %v2717_v8 = vpop.f32.mrb[7].mxu1 }
 0x5d2   :  { %v805_v9 = vrot.slane %v801_v7, 7 }
 0x5d4   :  { %814 = vrot.lane.b32.xlu0 %v805_v9, %s3014_s15  ;;  %v807_v10 = vadd.f32 %v805_v9, %v3133_v53 }
 0x5d6   :  { %v2541_v11 = vmul.f32 -1.442695, %v807_v10 }
 0x5d8   :  { %2936 = vpow2.f32 %v2541_v11 }
 0x5e2   :  { %v2937_v12 = vpop.eup %2936 }
 0x5e3   :  { %v811_v13 = vadd.f32 1.0, %v2937_v12 }
 0x5e5   :  { %2938 = vrcp.f32 %v811_v13 }
 0x5ef   :  { %v2939_v16 = vpop.eup %2938 }
 0x5f0   :  { %v824_v26 = vsub.f32 1.0, %v2939_v16  ;;  %v832_v30 = vmul.f32 %v2939_v16, %v830_v25 }
 0x646   :  { %v815_v17 = vpop.permute.xlu0 %814 }
 0x647   :  { %v817_v18 = vmul.f32 %v2939_v16, %v815_v17 }
 0x649   :  { %819 = vrot.lane.b32.xlu1 %v817_v18, %s3015_s16 }
 0x6bb   :  { %v820_v19 = vpop.permute.xlu1 %819 }
 0x6bc   :  { %v822_v20 = vadd.f32 %v820_v19, %v3133_v53 }
 0x6be   :  { %2940 = vtanh.f32 %v822_v20 }
 0x6c8   :  { %v2941_v21 = vpop.eup %2940 }
 0x6c9   :  { %826 = vrot.lane.b32.xlu0 %v2941_v21, %s3016_s17 }
 0x73b   :  { %v827_v28 = vpop.permute.xlu0 %826 }
 0x73c   :  { %v829_v29 = vmul.f32 %v827_v28, %v824_v26 }
 0x73e   :  { %v3152_v31 = vadd.f32 %v832_v30, %v829_v29 }
 0x740   :  { %v840_v32 = vrot.slane %v3152_v31, 1  ;;  %v941_v55 = vrot.slane %v3152_v31, 7 }
 0x742   :  { %841 = vrot.lane.b32.xlu1 %v840_v32, %s3016_s17 }
 0x7b4   :  { %v842_v33 = vpop.permute.xlu1 %841 }
 0x7b5   :  { %2723 = vmatmul.mubr.msk.f32.vlgmr.msra.gmra.mrb[8].mxu0 %vm41_vm0, %v842_v33 }
 0x7b6   :  { %2868 = vmatpush3.bf16.msra.mxu0 %v3097_v34  ;;  %2736 = vmatprep.mubr.msk.f32.mxu0 %vm3012_vm2, %v3013_v36 }
 0x7b7   :  { %2872 = vmatprep.subr.bf16.mxu0 %v3011_v35 }
 0x888   :  { %v911_v37 = vpop.f32.mrb[8].mxu0 }
 0x889   :  { %v912_v38 = vadd.f32 %v911_v37, %v3117_v42  ;;  %v2724_v39 = vpop.f32.mrb[9].mxu0 }
 0x88b   :  { %v916_v40 = vrot.slane %v912_v38, 6 }
 0x88d   :  { %925 = vrot.lane.b32.xlu0 %v916_v40, %s3014_s15  ;;  %v918_v41 = vadd.f32 %v916_v40, %v3133_v53 }
 0x88f   :  { %v2543_v43 = vmul.f32 -1.442695, %v918_v41 }
 0x891   :  { %2942 = vpow2.f32 %v2543_v43 }
 0x89b   :  { %v2943_v44 = vpop.eup %2942 }
 0x89c   :  { %v922_v45 = vadd.f32 1.0, %v2943_v44 }
 0x89e   :  { %2944 = vrcp.f32 %v922_v45 }
 0x8a8   :  { %v2945_v46 = vpop.eup %2944 }
 0x8a9   :  { %v935_v54 = vsub.f32 1.0, %v2945_v46  ;;  %v943_v57 = vmul.f32 %v2945_v46, %v941_v55 }
 0x8ff   :  { %v926_v47 = vpop.permute.xlu0 %925 }
 0x900   :  { %v928_v48 = vmul.f32 %v2945_v46, %v926_v47 }
 0x902   :  { %930 = vrot.lane.b32.xlu1 %v928_v48, %s3015_s16 }
 0x974   :  { %v931_v49 = vpop.permute.xlu1 %930 }
 0x975   :  { %v933_v50 = vadd.f32 %v931_v49, %v3133_v53 }
 0x977   :  { %2946 = vtanh.f32 %v933_v50 }
 0x981   :  { %v2947_v52 = vpop.eup %2946 }
 0x982   :  { %937 = vrot.lane.b32.xlu0 %v2947_v52, %s3016_s17 }
 0x9f4   :  { %v938_v56 = vpop.permute.xlu0 %937 }
 0x9f5   :  { %v940_v58 = vmul.f32 %v938_v56, %v935_v54 }
 0x9f7   :  { %v3168_v59 = vadd.f32 %v943_v57, %v940_v58 }
 0x9f9   :  { %v951_v60 = vrot.slane %v3168_v59, 2  ;;  %v1052_v13 = vrot.slane %v3168_v59, 7 }
 0x9fb   :  { %952 = vrot.lane.b32.xlu1 %v951_v60, %s3016_s17 }
 0xa6d   :  { %v953_v61 = vpop.permute.xlu1 %952 }
 0xa6e   :  { %2730 = vmatmul.mubr.msk.f32.vlgmr.msra.gmra.mrb[8].mxu1 %vm41_vm0, %v953_v61 }
 0xa6f   :  { %2871 = vmatpush3.bf16.msra.mxu1 %v3097_v34  ;;  %2743 = vmatprep.mubr.msk.f32.mxu1 %vm3012_vm2, %v3013_v36 }
 0xa70   :  { %2875 = vmatprep.subr.bf16.mxu1 %v3011_v35 }
 0xb41   :  { %v1022_v62 = vpop.f32.mrb[8].mxu1 }
 0xb42   :  { %v1023_v63 = vadd.f32 %v1022_v62, %v3117_v42  ;;  %v2731_v0 = vpop.f32.mrb[9].mxu1 }
 0xb44   :  { %v1027_v1 = vrot.slane %v1023_v63, 5 }
 0xb46   :  { %1036 = vrot.lane.b32.xlu0 %v1027_v1, %s3014_s15  ;;  %v1029_v2 = vadd.f32 %v1027_v1, %v3133_v53 }
 0xb48   :  { %v2545_v3 = vmul.f32 -1.442695, %v1029_v2 }
 0xb4a   :  { %2948 = vpow2.f32 %v2545_v3 }
 0xb54   :  { %v2949_v4 = vpop.eup %2948 }
 0xb55   :  { %v1033_v5 = vadd.f32 1.0, %v2949_v4 }
 0xb57   :  { %2950 = vrcp.f32 %v1033_v5 }
 0xb61   :  { %v2951_v6 = vpop.eup %2950 }
 0xb62   :  { %v1046_v12 = vsub.f32 1.0, %v2951_v6  ;;  %v1054_v17 = vmul.f32 %v2951_v6, %v1052_v13 }
 0xbb8   :  { %v1037_v7 = vpop.permute.xlu0 %1036 }
 0xbb9   :  { %v1039_v8 = vmul.f32 %v2951_v6, %v1037_v7 }
 0xbbb   :  { %1041 = vrot.lane.b32.xlu1 %v1039_v8, %s3015_s16 }
 0xc2d   :  { %v1042_v9 = vpop.permute.xlu1 %1041 }
 0xc2e   :  { %v1044_v10 = vadd.f32 %v1042_v9, %v3133_v53 }
 0xc30   :  { %2952 = vtanh.f32 %v1044_v10 }
 0xc3a   :  { %v2953_v11 = vpop.eup %2952 }
 0xc3b   :  { %1048 = vrot.lane.b32.xlu0 %v2953_v11, %s3016_s17 }
 0xcad   :  { %v1049_v16 = vpop.permute.xlu0 %1048 }
 0xcae   :  { %v1051_v18 = vmul.f32 %v1049_v16, %v1046_v12 }
 0xcb0   :  { %v3184_v19 = vadd.f32 %v1054_v17, %v1051_v18 }
 0xcb2   :  { %v1062_v20 = vrot.slane %v3184_v19, 3  ;;  %v1163_v46 = vrot.slane %v3184_v19, 7 }
 0xcb4   :  { %1063 = vrot.lane.b32.xlu1 %v1062_v20, %s3016_s17 }
 0xd26   :  { %v1064_v21 = vpop.permute.xlu1 %1063 }
 0xd27   :  { %2737 = vmatmul.mubr.msk.f32.vlgmr.msra.gmra.mrb[10].mxu0 %vm41_vm0, %v1064_v21 }
 0xd28   :  { %2874 = vmatpush3.bf16.msra.mxu0 %v3097_v34  ;;  %2750 = vmatprep.mubr.msk.f32.mxu0 %vm3012_vm2, %v3013_v36 }
 0xd29   :  { %2878 = vmatprep.subr.bf16.mxu0 %v3011_v35 }
 0xdfa   :  { %v1133_v25 = vpop.f32.mrb[10].mxu0 }
 0xdfb   :  { %v1134_v26 = vadd.f32 %v1133_v25, %v3117_v42  ;;  %v2738_v28 = vpop.f32.mrb[11].mxu0 }
 0xdfd   :  { %v1138_v29 = vrot.slane %v1134_v26, 4 }
 0xdff   :  { %1147 = vrot.lane.b32.xlu0 %v1138_v29, %s3014_s15  ;;  %v1140_v30 = vadd.f32 %v1138_v29, %v3133_v53 }
 0xe01   :  { %v2547_v32 = vmul.f32 -1.442695, %v1140_v30 }
 0xe03   :  { %2954 = vpow2.f32 %v2547_v32 }
 0xe0d   :  { %v2955_v33 = vpop.eup %2954 }
 0xe0e   :  { %v1144_v37 = vadd.f32 1.0, %v2955_v33 }
 0xe10   :  { %2956 = vrcp.f32 %v1144_v37 }
 0xe1a   :  { %v2957_v38 = vpop.eup %2956 }
 0xe1b   :  { %v1157_v45 = vsub.f32 1.0, %v2957_v38  ;;  %v1165_v48 = vmul.f32 %v2957_v38, %v1163_v46 }
 0xe71   :  { %v1148_v39 = vpop.permute.xlu0 %1147 }
 0xe72   :  { %v1150_v40 = vmul.f32 %v2957_v38, %v1148_v39 }
 0xe74   :  { %1152 = vrot.lane.b32.xlu1 %v1150_v40, %s3015_s16 }
 0xee6   :  { %v1153_v41 = vpop.permute.xlu1 %1152 }
 0xee7   :  { %v1155_v43 = vadd.f32 %v1153_v41, %v3133_v53 }
 0xee9   :  { %2958 = vtanh.f32 %v1155_v43 }
 0xef3   :  { %v2959_v44 = vpop.eup %2958 }
 0xef4   :  { %1159 = vrot.lane.b32.xlu0 %v2959_v44, %s3016_s17 }
 0xf66   :  { %v1160_v47 = vpop.permute.xlu0 %1159 }
 0xf67   :  { %v1162_v49 = vmul.f32 %v1160_v47, %v1157_v45 }
 0xf69   :  { %v3200_v50 = vadd.f32 %v1165_v48, %v1162_v49 }
 0xf6b   :  { %v1173_v52 = vrot.slane %v3200_v50, 4  ;;  %v1274_v7 = vrot.slane %v3200_v50, 7 }
 0xf6d   :  { %1174 = vrot.lane.b32.xlu1 %v1173_v52, %s3016_s17 }
 0xfdf   :  { %v1175_v54 = vpop.permute.xlu1 %1174 }
 0xfe0   :  { %2744 = vmatmul.mubr.msk.f32.vlgmr.msra.gmra.mrb[10].mxu1 %vm41_vm0, %v1175_v54 }
 0xfe1   :  { %2877 = vmatpush3.bf16.msra.mxu1 %v3097_v34  ;;  %2757 = vmatprep.mubr.msk.f32.mxu1 %vm3012_vm2, %v3013_v36 }
 0xfe2   :  { %2881 = vmatprep.subr.bf16.mxu1 %v3011_v35 }
0x10b3   :  { %v1244_v55 = vpop.f32.mrb[10].mxu1 }
0x10b4   :  { %v1245_v56 = vadd.f32 %v1244_v55, %v3117_v42  ;;  %v2745_v57 = vpop.f32.mrb[11].mxu1 }
0x10b6   :  { %v1249_v58 = vrot.slane %v1245_v56, 3 }
0x10b8   :  { %1258 = vrot.lane.b32.xlu0 %v1249_v58, %s3014_s15  ;;  %v1251_v60 = vadd.f32 %v1249_v58, %v3133_v53 }
0x10ba   :  { %v2549_v61 = vmul.f32 -1.442695, %v1251_v60 }
0x10bc   :  { %2960 = vpow2.f32 %v2549_v61 }
0x10c6   :  { %v2961_v62 = vpop.eup %2960 }
0x10c7   :  { %v1255_v63 = vadd.f32 1.0, %v2961_v62 }
0x10c9   :  { %2962 = vrcp.f32 %v1255_v63 }
0x10d3   :  { %v2963_v0 = vpop.eup %2962 }
0x10d4   :  { %v1268_v6 = vsub.f32 1.0, %v2963_v0  ;;  %v1276_v9 = vmul.f32 %v2963_v0, %v1274_v7 }
0x112a   :  { %v1259_v1 = vpop.permute.xlu0 %1258 }
0x112b   :  { %v1261_v2 = vmul.f32 %v2963_v0, %v1259_v1 }
0x112d   :  { %1263 = vrot.lane.b32.xlu1 %v1261_v2, %s3015_s16 }
0x119f   :  { %v1264_v3 = vpop.permute.xlu1 %1263 }
0x11a0   :  { %v1266_v4 = vadd.f32 %v1264_v3, %v3133_v53 }
0x11a2   :  { %2964 = vtanh.f32 %v1266_v4 }
0x11ac   :  { %v2965_v5 = vpop.eup %2964 }
0x11ad   :  { %1270 = vrot.lane.b32.xlu0 %v2965_v5, %s3016_s17 }
0x121f   :  { %v1271_v8 = vpop.permute.xlu0 %1270 }
0x1220   :  { %v1273_v10 = vmul.f32 %v1271_v8, %v1268_v6 }
0x1222   :  { %v3216_v11 = vadd.f32 %v1276_v9, %v1273_v10 }
0x1224   :  { %v1284_v12 = vrot.slane %v3216_v11, 5  ;;  %v1385_v40 = vrot.slane %v3216_v11, 7 }
0x1226   :  { %1285 = vrot.lane.b32.xlu1 %v1284_v12, %s3016_s17 }
0x1298   :  { %v1286_v13 = vpop.permute.xlu1 %1285 }
0x1299   :  { %2751 = vmatmul.mubr.msk.f32.vlgmr.msra.gmra.mrb[12].mxu0 %vm41_vm0, %v1286_v13 }
0x129a   :  { %2880 = vmatpush3.bf16.msra.mxu0 %v3097_v34  ;;  %2764 = vmatprep.mubr.msk.f32.mxu0 %vm3012_vm2, %v3013_v36 }
0x129b   :  { %2884 = vmatprep.subr.bf16.mxu0 %v3011_v35 }
0x136c   :  { %v1355_v16 = vpop.f32.mrb[12].mxu0 }
0x136d   :  { %v1356_v17 = vadd.f32 %v1355_v16, %v3117_v42  ;;  %v2752_v18 = vpop.f32.mrb[13].mxu0 }
0x136f   :  { %v1360_v20 = vrot.slane %v1356_v17, 2 }
0x1371   :  { %1369 = vrot.lane.b32.xlu0 %v1360_v20, %s3014_s15  ;;  %v1362_v21 = vadd.f32 %v1360_v20, %v3133_v53 }
0x1373   :  { %v2551_v25 = vmul.f32 -1.442695, %v1362_v21 }
0x1375   :  { %2966 = vpow2.f32 %v2551_v25 }
0x137f   :  { %v2967_v26 = vpop.eup %2966 }
0x1380   :  { %v1366_v28 = vadd.f32 1.0, %v2967_v26 }
0x1382   :  { %2968 = vrcp.f32 %v1366_v28 }
0x138c   :  { %v2969_v29 = vpop.eup %2968 }
0x138d   :  { %v1379_v39 = vsub.f32 1.0, %v2969_v29  ;;  %v1387_v43 = vmul.f32 %v2969_v29, %v1385_v40 }
0x13e3   :  { %v1370_v30 = vpop.permute.xlu0 %1369 }
0x13e4   :  { %v1372_v32 = vmul.f32 %v2969_v29, %v1370_v30 }
0x13e6   :  { %1374 = vrot.lane.b32.xlu1 %v1372_v32, %s3015_s16 }
0x1458   :  { %v1375_v33 = vpop.permute.xlu1 %1374 }
0x1459   :  { %v1377_v37 = vadd.f32 %v1375_v33, %v3133_v53 }
0x145b   :  { %2970 = vtanh.f32 %v1377_v37 }
0x1465   :  { %v2971_v38 = vpop.eup %2970 }
0x1466   :  { %1381 = vrot.lane.b32.xlu0 %v2971_v38, %s3016_s17 }
0x14d8   :  { %v1382_v41 = vpop.permute.xlu0 %1381 }
0x14d9   :  { %v1384_v44 = vmul.f32 %v1382_v41, %v1379_v39 }
0x14db   :  { %v3232_v45 = vadd.f32 %v1387_v43, %v1384_v44 }
0x14dd   :  { %v1395_v46 = vrot.slane %v3232_v45, 6  ;;  %v1496_v3 = vrot.slane %v3232_v45, 7 }
0x14df   :  { %1396 = vrot.lane.b32.xlu1 %v1395_v46, %s3016_s17 }
0x1551   :  { %v1397_v47 = vpop.permute.xlu1 %1396 }
0x1552   :  { %2758 = vmatmul.mubr.msk.f32.vlgmr.msra.gmra.mrb[12].mxu1 %vm41_vm0, %v1397_v47 }
0x1553   :  { %2883 = vmatpush3.bf16.msra.mxu1 %v3097_v34  ;;  %2771 = vmatprep.mubr.msk.f32.mxu1 %vm3012_vm2, %v3013_v36 }
0x1554   :  { %2887 = vmatprep.subr.bf16.mxu1 %v3011_v35 }
0x1625   :  { %v1466_v48 = vpop.f32.mrb[12].mxu1 }
0x1626   :  { %v1467_v49 = vadd.f32 %v1466_v48, %v3117_v42  ;;  %v2759_v52 = vpop.f32.mrb[13].mxu1 }
0x1628   :  { %v1471_v54 = vrot.slane %v1467_v49, 1 }
0x162a   :  { %1480 = vrot.lane.b32.xlu0 %v1471_v54, %s3014_s15  ;;  %v1473_v55 = vadd.f32 %v1471_v54, %v3133_v53 }
0x162c   :  { %v2553_v56 = vmul.f32 -1.442695, %v1473_v55 }
0x162e   :  { %2972 = vpow2.f32 %v2553_v56 }
0x1638   :  { %v2973_v57 = vpop.eup %2972 }
0x1639   :  { %v1477_v58 = vadd.f32 1.0, %v2973_v57 }
0x163b   :  { %2974 = vrcp.f32 %v1477_v58 }
0x1645   :  { %v2975_v60 = vpop.eup %2974 }
0x1646   :  { %v1490_v2 = vsub.f32 1.0, %v2975_v60  ;;  %v1498_v5 = vmul.f32 %v2975_v60, %v1496_v3 }
0x169c   :  { %v1481_v61 = vpop.permute.xlu0 %1480 }
0x169d   :  { %v1483_v62 = vmul.f32 %v2975_v60, %v1481_v61 }
0x169f   :  { %1485 = vrot.lane.b32.xlu1 %v1483_v62, %s3015_s16 }
0x1711   :  { %v1486_v63 = vpop.permute.xlu1 %1485 }
0x1712   :  { %v1488_v0 = vadd.f32 %v1486_v63, %v3133_v53 }
0x1714   :  { %2976 = vtanh.f32 %v1488_v0 }
0x171e   :  { %v2977_v1 = vpop.eup %2976 }
0x171f   :  { %1492 = vrot.lane.b32.xlu0 %v2977_v1, %s3016_s17 }
0x1791   :  { %v1493_v4 = vpop.permute.xlu0 %1492 }
0x1792   :  { %v1495_v6 = vmul.f32 %v1493_v4, %v1490_v2 }
0x1794   :  { %v3248_v7 = vadd.f32 %v1498_v5, %v1495_v6 }
0x1796   :  { %v1506_v8 = vrot.slane %v3248_v7, 7 }
0x1798   :  { %1507 = vrot.lane.b32.xlu1 %v1506_v8, %s3016_s17 }
0x180a   :  { %v1508_v9 = vpop.permute.xlu1 %1507 }
0x180b   :  { %2765 = vmatmul.mubr.msk.f32.vlgmr.msra.gmra.mrb[14].mxu0 %vm41_vm0, %v1508_v9 }
0x180c   :  { %2886 = vmatpush3.bf16.msra.mxu0 %v3097_v34  ;;  %2778 = vmatprep.mubr.msk.f32.mxu0 %vm3012_vm2, %v3013_v36 }
0x18de   :  { %v1577_v53 = vpop.f32.mrb[14].mxu0 }
0x18df   :  { %v1578_v10 = vadd.f32 %v1577_v53, %v3117_v42  ;;  %v2766_v12 = vpop.f32.mrb[15].mxu0 }
0x18e1   :  { %1589 = vrot.lane.b32.xlu0 %v1578_v10, %s3014_s15  ;;  %v1581_v13 = vadd.f32 %v1578_v10, %v3131_v51 }
0x18e3   :  { %v2555_v16 = vmul.f32 -1.442695, %v1581_v13 }
0x18e5   :  { %2978 = vpow2.f32 %v2555_v16 }
0x18ef   :  { %v2979_v17 = vpop.eup %2978 }
0x18f0   :  { %v1585_v18 = vadd.f32 1.0, %v2979_v17 }
0x18f2   :  { %2980 = vrcp.f32 %v1585_v18 }
0x18fc   :  { %v2981_v20 = vpop.eup %2980 }
0x18fd   :  { %v1599_v30 = vsub.f32 1.0, %v2981_v20  ;;  %v1606_v33 = vmul.f32 %v2981_v20, %v1506_v8 }
0x1953   :  { %v1590_v21 = vpop.permute.xlu0 %1589 }
0x1954   :  { %v1592_v25 = vmul.f32 %v2981_v20, %v1590_v21 }
0x1956   :  { %1594 = vrot.lane.b32.xlu1 %v1592_v25, %s3015_s16 }
0x19c8   :  { %v1595_v26 = vpop.permute.xlu1 %1594 }
0x19c9   :  { %v1597_v28 = vadd.f32 %v1595_v26, %v3131_v51 }
0x19cb   :  { %2982 = vtanh.f32 %v1597_v28 }
0x19d5   :  { %v2983_v29 = vpop.eup %2982 }
0x19d6   :  { %1601 = vrot.lane.b32.xlu0 %v2983_v29, %s3016_s17 }
0x1a48   :  { %v1602_v32 = vpop.permute.xlu0 %1601 }
0x1a49   :  { %v1604_v37 = vmul.f32 %v1602_v32, %v1599_v30 }
0x1a4b   :  { %v1607_v38 = vadd.f32 %v1606_v33, %v1604_v37 }
0x1a4d   :  { %1609 = vrot.lane.b32.xlu1 %v1607_v38, %s3016_s17  ;;  %v1711_v58 = vrot.slane %v1607_v38, 7 }
0x1abf   :  { %v1610_v39 = vpop.permute.xlu1 %1609 }
0x1ac0   :  { %1612 = vst.msk [vmem:[#allocation2 + $0x8] sm:$0x1] %vm730_vm3, %v1610_v39  ;;  %2772 = vmatmul.mubr.msk.f32.vlgmr.msra.gmra.mrb[14].mxu1 %vm41_vm0, %v1610_v39 }
0x1ac1   :  { %2889 = vmatpush3.bf16.msra.mxu1 %v3097_v34  ;;  %2785 = vmatprep.mubr.msk.f32.mxu1 %vm3012_vm2, %v3013_v36 }
0x1b93   :  { %v1681_v40 = vpop.f32.mrb[14].mxu1 }
0x1b94   :  { %v1682_v41 = vadd.f32 %v1681_v40, %v3117_v42  ;;  %v2773_v43 = vpop.f32.mrb[15].mxu1 }
0x1b96   :  { %v1686_v44 = vrot.slane %v1682_v41, 7 }
0x1b98   :  { %1695 = vrot.lane.b32.xlu0 %v1686_v44, %s3014_s15  ;;  %v1688_v46 = vadd.f32 %v1686_v44, %v3131_v51 }
0x1b9a   :  { %v2557_v47 = vmul.f32 -1.442695, %v1688_v46 }
0x1b9c   :  { %2984 = vpow2.f32 %v2557_v47 }
0x1ba6   :  { %v2985_v48 = vpop.eup %2984 }
0x1ba7   :  { %v1692_v49 = vadd.f32 1.0, %v2985_v48 }
0x1ba9   :  { %2986 = vrcp.f32 %v1692_v49 }
0x1bb3   :  { %v2987_v52 = vpop.eup %2986 }
0x1bb4   :  { %v1705_v60 = vsub.f32 1.0, %v2987_v52  ;;  %v1713_v63 = vmul.f32 %v2987_v52, %v1711_v58 }
0x1c0a   :  { %v1696_v54 = vpop.permute.xlu0 %1695 }
0x1c0b   :  { %v1698_v34 = vmul.f32 %v2987_v52, %v1696_v54 }
0x1c0d   :  { %1700 = vrot.lane.b32.xlu1 %v1698_v34, %s3015_s16 }
0x1c7f   :  { %v1701_v55 = vpop.permute.xlu1 %1700 }
0x1c80   :  { %v1703_v56 = vadd.f32 %v1701_v55, %v3131_v51 }
0x1c82   :  { %2988 = vtanh.f32 %v1703_v56 }
0x1c8c   :  { %v2989_v57 = vpop.eup %2988 }
0x1c8d   :  { %1707 = vrot.lane.b32.xlu0 %v2989_v57, %s3016_s17 }
0x1cff   :  { %v1708_v61 = vpop.permute.xlu0 %1707 }
0x1d00   :  { %v1710_v62 = vmul.f32 %v1708_v61, %v1705_v60 }
0x1d02   :  { %v3274_v0 = vadd.f32 %v1713_v63, %v1710_v62 }
0x1d04   :  { %v1720_v1 = vrot.slane %v3274_v0, 1  ;;  %v1821_v25 = vrot.slane %v3274_v0, 7 }
0x1d06   :  { %1721 = vrot.lane.b32.xlu1 %v1720_v1, %s3016_s17 }
0x1d78   :  { %v1722_v2 = vpop.permute.xlu1 %1721 }
0x1d79   :  { %2779 = vmatmul.mubr.msk.f32.vlgmr.msra.gmra.mrb[16].mxu0 %vm41_vm0, %v1722_v2 }
0x1e4c   :  { %v1791_v3 = vpop.f32.mrb[16].mxu0 }
0x1e4d   :  { %v1792_v4 = vadd.f32 %v1791_v3, %v3117_v42  ;;  %v2780_v5 = vpop.f32.mrb[17].mxu0 }
0x1e4f   :  { %v1796_v6 = vrot.slane %v1792_v4, 6 }
0x1e51   :  { %1805 = vrot.lane.b32.xlu0 %v1796_v6, %s3014_s15  ;;  %v1798_v8 = vadd.f32 %v1796_v6, %v3131_v51  ;;  %v40_v6 = vld [vmem:[%s3404_s0 + $0x60] sm:$0xff] }
0x1e53   :  { %v2559_v9 = vmul.f32 -1.442695, %v1798_v8  ;;  %v19_v8 = vld [vmem:[%s3405_s1 + $0x40] sm:$0xff] }
0x1e55   :  { %2990 = vpow2.f32 %v2559_v9  ;;  %v20_v9 = vld [vmem:[%s3405_s1 + $0x48] sm:$0xff] }
0x1e5f   :  { %v2991_v53 = vpop.eup %2990 }
0x1e60   :  { %v1802_v10 = vadd.f32 1.0, %v2991_v53  ;;  %v2900_v53 = vpack.c.bf16 %v20_v9, %v19_v8 }
0x1e62   :  { %2992 = vrcp.f32 %v1802_v10 }
0x1e6c   :  { %v2993_v12 = vpop.eup %2992 }
0x1e6d   :  { %v1815_v21 = vsub.f32 1.0, %v2993_v12  ;;  %v1823_v28 = vmul.f32 %v2993_v12, %v1821_v25 }
0x1ec3   :  { %v1806_v13 = vpop.permute.xlu0 %1805 }
0x1ec4   :  { %v1808_v16 = vmul.f32 %v2993_v12, %v1806_v13  ;;  %v2192_v13 = vsub.s32 3, %v3061_v14 }
0x1ec6   :  { %1810 = vrot.lane.b32.xlu1 %v1808_v16, %s3015_s16  ;;  %v2205_v16 = vsub.s32 4, %v3061_v14 }
0x1f38   :  { %v1811_v17 = vpop.permute.xlu1 %1810 }
0x1f39   :  { %v1813_v18 = vadd.f32 %v1811_v17, %v3131_v51  ;;  %v3354_v17 = vld [vmem:[%s3405_s1 + $0x80] sm:$0xff] }
0x1f3a   :  { %v2193_v23 = vrot.slane %v3354_v17, %v2192_v13 }
0x1f3b   :  { %2994 = vtanh.f32 %v1813_v18 }
0x1f45   :  { %v2995_v20 = vpop.eup %2994 }
0x1f46   :  { %1817 = vrot.lane.b32.xlu0 %v2995_v20, %s3016_s17 }
0x1fb8   :  { %v1818_v26 = vpop.permute.xlu0 %1817 }
0x1fb9   :  { %v1820_v29 = vmul.f32 %v1818_v26, %v1815_v21 }
0x1fbb   :  { %v1824_v30 = vadd.f32 %v1823_v28, %v1820_v29 }
0x1fbd   :  { %v1830_v32 = vrot.slane %v1824_v30, 2  ;;  %v1931_v55 = vrot.slane %v1824_v30, 7 }
0x1fbf   :  { %1831 = vrot.lane.b32.xlu1 %v1830_v32, %s3016_s17 }
0x2031   :  { %v1832_v33 = vpop.permute.xlu1 %1831 }
0x2032   :  { %2786 = vmatmul.mubr.msk.f32.vlgmr.msra.gmra.mrb[16].mxu1 %vm41_vm0, %v1832_v33 }
0x2105   :  { %v1901_v37 = vpop.f32.mrb[16].mxu1 }
0x2106   :  { %v1902_v38 = vadd.f32 %v1901_v37, %v3117_v42  ;;  %v2787_v39 = vpop.f32.mrb[17].mxu1 }
0x2108   :  { %v1906_v40 = vrot.slane %v1902_v38, 5 }
0x210a   :  { %1915 = vrot.lane.b32.xlu0 %v1906_v40, %s3014_s15  ;;  %v1908_v41 = vadd.f32 %v1906_v40, %v3131_v51 }
0x210c   :  { %v2561_v43 = vmul.f32 -1.442695, %v1908_v41 }
0x210e   :  { %2996 = vpow2.f32 %v2561_v43 }
0x2118   :  { %v2997_v44 = vpop.eup %2996 }
0x2119   :  { %v1912_v46 = vadd.f32 1.0, %v2997_v44 }
0x211b   :  { %2998 = vrcp.f32 %v1912_v46 }
0x2125   :  { %v2999_v47 = vpop.eup %2998 }
0x2126   :  { %v1925_v34 = vsub.f32 1.0, %v2999_v47  ;;  %v1933_v57 = vmul.f32 %v2999_v47, %v1931_v55 }
0x217c   :  { %v1916_v48 = vpop.permute.xlu0 %1915 }
0x217d   :  { %v1918_v49 = vmul.f32 %v2999_v47, %v1916_v48 }
0x217f   :  { %1920 = vrot.lane.b32.xlu1 %v1918_v49, %s3015_s16 }
0x2183   :  { %835 = vrot.lane.b32.xlu1 %v3152_v31, %s3016_s17 }
0x2187   :  { %1057 = vrot.lane.b32.xlu1 %v3184_v19, %s3016_s17 }
0x218b   :  { %1279 = vrot.lane.b32.xlu1 %v3216_v11, %s3016_s17 }
0x218f   :  { %1501 = vrot.lane.b32.xlu1 %v3248_v7, %s3016_s17 }
0x2193   :  { %1826 = vrot.lane.b32.xlu1 %v1824_v30, %s3016_s17 }
0x21f1   :  { %v1921_v42 = vpop.permute.xlu1 %1920 }
0x21f2   :  { %v1923_v52 = vadd.f32 %v1921_v42, %v3131_v51 }
0x21f4   :  { %3000 = vtanh.f32 %v1923_v52 }
0x21f5   :  { %v836_v54 = vpop.permute.xlu1 %835 }
0x21f6   :  { %839 = vst.msk [vmem:[#allocation2] sm:$0x2] %vm838_vm4, %v836_v54 }
0x21f9   :  { %v1058_v31 = vpop.permute.xlu1 %1057 }
0x21fa   :  { %1061 = vst.msk [vmem:[#allocation2] sm:$0x8] %vm1060_vm5, %v1058_v31 }
0x21fd   :  { %v1280_v19 = vpop.permute.xlu1 %1279 }
0x21fe   :  { %v3001_v11 = vpop.eup %3000  ;;  %1283 = vst.msk [vmem:[#allocation2] sm:$0x20] %vm1282_vm6, %v1280_v19 }
0x21ff   :  { %1927 = vrot.lane.b32.xlu0 %v3001_v11, %s3016_s17 }
0x2201   :  { %v1502_v7 = vpop.permute.xlu1 %1501 }
0x2202   :  { %1505 = vst.msk [vmem:[#allocation2] sm:$0x80] %vm1504_vm7, %v1502_v7 }
0x2203   :  { %946 = vrot.lane.b32.xlu0 %v3168_v59, %s3016_s17  ;;  %v39_v59 = vld [vmem:[%s3404_s0 + $0x58] sm:$0xff] }
0x2204   :  { %2792 = vmatprep.mubr.msk.f32.mxu0 %vm1942_vm9, %v39_v59 }
0x2205   :  { %v1827_v51 = vpop.permute.xlu1 %1826 }
0x2206   :  { %1829 = vst.msk [vmem:[#allocation2 + $0x8] sm:$0x4] %vm949_vm8, %v1827_v51  ;;  %v32_v51 = vld [vmem:[%s3404_s0 + $0x20] sm:$0xff] }
0x2207   :  { %1168 = vrot.lane.b32.xlu0 %v3200_v50, %s3016_s17  ;;  %v21_v50 = vld [vmem:[%s3405_s1 + $0x50] sm:$0xff] }
0x220b   :  { %1390 = vrot.lane.b32.xlu0 %v3232_v45, %s3016_s17  ;;  %v22_v45 = vld [vmem:[%s3405_s1 + $0x58] sm:$0xff] }
0x220c   :  { %v2896_v62 = vpack.c.bf16 %v22_v45, %v21_v50 }
0x220e   :  { %2897 = vmatprep.subr.bf16.mxu1 %v2896_v62 }
0x220f   :  { %1716 = vrot.lane.b32.xlu0 %v3274_v0, %s3016_s17  ;;  %2899 = vmatpush3.bf16.msra.mxu1 %v2896_v62 }
0x2210   :  { %2901 = vmatprep.subr.bf16.mxu1 %v2900_v53 }
0x2271   :  { %v1928_v56 = vpop.permute.xlu0 %1927 }
0x2272   :  { %v1930_v58 = vmul.f32 %v1928_v56, %v1925_v34  ;;  %v33_v56 = vld [vmem:[%s3404_s0 + $0x28] sm:$0xff] }
0x2274   :  { %v1934_v60 = vadd.f32 %v1933_v57, %v1930_v58 }
0x2275   :  { %v947_v61 = vpop.permute.xlu0 %946 }
0x2276   :  { %950 = vst.msk [vmem:[#allocation2] sm:$0x4] %vm949_vm8, %v947_v61  ;;  %1936 = vrot.lane.b32.xlu0 %v1934_v60, %s3016_s17 }
0x2279   :  { %v1169_v63 = vpop.permute.xlu0 %1168 }
0x227a   :  { %1172 = vst.msk [vmem:[#allocation2] sm:$0x10] %vm1171_vm10, %v1169_v63 }
0x227d   :  { %v1391_v0 = vpop.permute.xlu0 %1390 }
0x227e   :  { %1394 = vst.msk [vmem:[#allocation2] sm:$0x40] %vm1393_vm11, %v1391_v0 }
0x2281   :  { %v1717_v1 = vpop.permute.xlu0 %1716 }
0x2282   :  { %1719 = vst.msk [vmem:[#allocation2 + $0x8] sm:$0x2] %vm838_vm4, %v1717_v1  ;;  %v23_v1 = vld [vmem:[%s3405_s1 + $0x60] sm:$0xff] }
0x2285   :  { %v1940_v3 = vld [vmem:[#allocation2] sm:$0xff] }
0x22e8   :  { %v1937_v2 = vpop.permute.xlu0 %1936 }
0x22e9   :  { %1939 = vst.msk [vmem:[#allocation2 + $0x8] sm:$0x8] %vm1060_vm5, %v1937_v2  ;;  %v24_v2 = vld [vmem:[%s3405_s1 + $0x68] sm:$0xff] }
0x22f0   :  { %v1941_v4 = vld [vmem:[#allocation2 + $0x8] sm:$0xf] }
0x22f1   :  { %v2890_v5 = vpack.c.bf16 %v1941_v4, %v1940_v3  ;;  %v25_v3 = vld [vmem:[%s3405_s1 + $0x70] sm:$0xff]  ;;  %v2912_v4 = vpack.c.bf16 %v24_v2, %v23_v1 }
0x22f3   :  { %2892 = vmatprep.subr.msk.bf16.mxu0 %vm2891_vm14, %v2890_v5 }
0x22f4   :  { %2895 = vmatpush3.bf16.msk.msra.mxu0 %vm2891_vm14, %v2890_v5  ;;  %v26_v5 = vld [vmem:[%s3405_s1 + $0x78] sm:$0xff] }
0x22f7   :  { %2793 = vmatmul.mubr.msk.f32.vlgmr.msra.gmra.mrb[18].mxu0 %vm1942_vm9, %v40_v6  ;;  %v2915_v6 = vpack.c.bf16 %v26_v5, %v25_v3 }
0x23ca   :  { %v2794_v10 = vpop.f32.mrb[18].mxu0 }
0x23cb   :  { %v2019_v12 = vpop.f32.mrb[19].mxu0 }
0x23cc   :  { %2799 = vmatprep.mubr.msk.f32.mxu1 %vm41_vm0, %v2019_v12 }
0x23cd   :  { %2800 = vmatmul.mubr.msk.f32.vlgmr.msra.gmra.mrb[18].mxu1 %vm41_vm0, %v2794_v10 }
0x23ce   :  { %2903 = vmatpush3.bf16.msra.mxu1 %v2900_v53  ;;  %2806 = vmatprep.mubr.msk.f32.mxu1 %vm41_vm0, %v292_v27  ;;  %v2206_v27 = vrot.slane %v3354_v17, %v2205_v16 }
0x23cf   :  { %2911 = vmatprep.subr.bf16.mxu1 %v3011_v35 }
0x23d5   :  { %2807 = vmatmul.mubr.msk.f32.vlgmr.msra.gmra.mrb[18].mxu1 %vm41_vm0, %v293_v24 }
0x23d6   :  { %2831 = vmatprep.mubr.msk.f32.mxu1 %vm3012_vm2, %v3013_v36  ;;  %2913 = vmatpush3.bf16.msra.mxu1 %v2912_v4 }
0x23d7   :  { %2914 = vmatprep.subr.bf16.mxu1 %v3011_v35 }
0x23da   :  { %2916 = vmatpush3.bf16.msra.mxu1 %v2915_v6 }
0x24a8   :  { %v2808_v18 = vpop.f32.mrb[18].mxu1 }
0x24a9   :  { %v2181_v22 = vpop.f32.mrb[19].mxu1  ;;  %v2195_v24 = vmul.f32 %v2808_v18, %v2193_v23  ;;  %v2208_v29 = vmul.f32 %v2808_v18, %v2206_v27 }
0x24aa   :  { %v2904_v20 = vpack.c.bf16 %v2808_v18, %v2181_v22  ;;  %v2194_v21 = vmul.f32 %v2193_v23, %v2181_v22  ;;  %v2207_v26 = vmul.f32 %v2206_v27, %v2181_v22  ;;  %v38_v27 = vld [vmem:[%s3404_s0 + $0x50] sm:$0x3]  ;;  %v2445_v22 = vsub.s32 6, %v3061_v14 }
0x24ab   :  { %v2200_v25 = vsel %vm2196_vm15, %v2195_v24, 0.0  ;;  %v2212_v32 = vsel %vm2196_vm15, %v2208_v29, 0.0 }
0x24ac   :  { %2201 = vadd.xlane.f32.xlu0 %v2200_v25  ;;  %2905 = vmatprep.subr.bf16.mxu0 %v2904_v20  ;;  %v2197_v28 = vsel %vm2196_vm15, %v2194_v21, 0.0  ;;  %v2209_v30 = vsel %vm2196_vm15, %v2207_v26, 0.0  ;;  %v2446_v24 = vrot.slane %v3354_v17, %v2445_v22 }
0x24ad   :  { %2907 = vmatpush3.bf16.msra.mxu0 %v2904_v20  ;;  %2198 = vadd.xlane.f32.xlu1 %v2197_v28 }
0x24ae   :  { %2908 = vmatprep.subr.bf16.mxu0 %v3011_v35 }
0x24b0   :  { %2210 = vadd.xlane.f32.xlu0 %v2209_v30 }
0x24b1   :  { %2213 = vadd.xlane.f32.xlu1 %v2212_v32 }
0x2539   :  { %v2202_v37 = vpop.xlane.xlu0 %2201 }
0x253a   :  { %v2199_v33 = vpop.xlane.xlu1 %2198 }
0x253b   :  { %2215 = vxpose.xlu0.b32.start [1/2] (short) (narrow) %v2199_v33, 8 }
0x253d   :  { %v2211_v38 = vpop.xlane.xlu0 %2210 }
0x253e   :  { %v2214_v41 = vpop.xlane.xlu1 %2213 }
0x253f   :  { %2216 = vxpose.xlu0.b32.end [2/2] (short) (narrow) %v2202_v37, 8 }
0x25bb   :  { %v2231_v39 = vpop.trf.xlu0 }
0x25bc   :  { %v2250_v40 = vrot.slane %v2231_v39, %v288_v15 }
0x25be   :  { %v2251_v43 = vadd.f32 %v2250_v40, %v2211_v38  ;;  %v2252_v44 = vadd.f32 %v2250_v40, %v2214_v41 }
0x25c0   :  { %vm2253_vm1 = vcmp.ge.f32.partialorder %v2251_v43, 0.0  ;;  %v2255_v46 = vmul.f32 0.2, %v2251_v43  ;;  %v2256_v47 = vmul.f32 0.2, %v2252_v44  ;;  %vm2254_vm3 = vcmp.ge.f32.partialorder %v2252_v44, 0.0 }
0x25c2   :  { %v2257_v48 = vsel %vm2253_vm1, %v2251_v43, %v2255_v46  ;;  %v2258_v42 = vsel %vm2254_vm3, %v2252_v44, %v2256_v47 }
0x25c3   :  { %v2259_v49 = vsel %vm41_vm0, %v2257_v48, -inf  ;;  %v2262_v52 = vsel %vm41_vm0, %v2258_v42, -inf }
0x25c4   :  { %2260 = vmax.xlane.f32.xlu1 %v2259_v49 }
0x25c8   :  { %2263 = vmax.xlane.f32.xlu1 %v2262_v52 }
0x2651   :  { %v2261_v54 = vpop.xlane.xlu1 %2260 }
0x2652   :  { %v2265_v31 = vsub.f32 %v2257_v48, %v2261_v54 }
0x2654   :  { %v2267_v19 = vmul.f32 1.442695, %v2265_v31 }
0x2655   :  { %v2264_v11 = vpop.xlane.xlu1 %2263 }
0x2656   :  { %3002 = vpow2.f32 %v2267_v19  ;;  %v2266_v15 = vsub.f32 %v2258_v42, %v2264_v11 }
0x2658   :  { %v2269_v7 = vmul.f32 1.442695, %v2266_v15 }
0x265a   :  { %3004 = vpow2.f32 %v2269_v7 }
0x2660   :  { %v3003_v34 = vpop.eup %3002 }
0x2661   :  { %v2271_v55 = vmul.f32 %v3003_v34, %v32_v51 }
0x2663   :  { %v2273_v57 = vsel %vm41_vm0, %v2271_v55, 0.0 }
0x2664   :  { %v3005_v58 = vpop.eup %3004  ;;  %2274 = vadd.xlane.f32.xlu1 %v2273_v57 }
0x2665   :  { %v2272_v60 = vmul.f32 %v3005_v58, %v33_v56 }
0x2667   :  { %v2276_v59 = vsel %vm41_vm0, %v2272_v60, 0.0 }
0x2668   :  { %2277 = vadd.xlane.f32.xlu1 %v2276_v59 }
0x26f1   :  { %v2275_v61 = vpop.xlane.xlu1 %2274 }
0x26f2   :  { %3006 = vrcp.f32 %v2275_v61 }
0x26f5   :  { %v2278_v50 = vpop.xlane.xlu1 %2277 }
0x26f6   :  { %3008 = vrcp.f32 %v2278_v50 }
0x26fc   :  { %v3007_v45 = vpop.eup %3006 }
0x26fd   :  { %v2280_v62 = vmul.f32 %v3007_v45, %v2271_v55 }
0x26ff   :  { %2813 = vmatprep.mubr.msk.f32.mxu0 %vm41_vm0, %v2280_v62 }
0x2700   :  { %v3009_v63 = vpop.eup %3008 }
0x2701   :  { %v2282_v0 = vmul.f32 %v3009_v63, %v2272_v60 }
0x2703   :  { %2814 = vmatmul.mubr.msk.f32.vlgmr.msra.gmra.mrb[20].mxu0 %vm41_vm0, %v2282_v0 }
0x2704   :  { %2820 = vmatprep.mubr.msk.f32.mxu0 %vm3012_vm2, %v3013_v36  ;;  %v2285_v36 = vsub.s32 5, %v3061_v14 }
0x2706   :  { %v2286_v8 = vrot.slane %v3354_v17, %v2285_v36 }
0x27d6   :  { %v2815_v9 = vpop.f32.mrb[20].mxu0 }
0x27d7   :  { %v2365_v53 = vadd.f32 %v2815_v9, %v2286_v8  ;;  %v2359_v10 = vpop.f32.mrb[21].mxu0 }
0x27d8   :  { %v2360_v12 = vadd.f32 %v2359_v10, %v2286_v8 }
0x27d9   :  { %v2369_v13 = vmax.f32 %v2365_v53, 0.0 }
0x27da   :  { %v2368_v16 = vmax.f32 %v2360_v12, 0.0 }
0x27dc   :  { %v2909_v23 = vpack.c.bf16 %v2369_v13, %v2368_v16 }
0x27de   :  { %2910 = vmatpush3.bf16.msra.mxu0 %v2909_v23 }
0x27e1   :  { %2821 = vmatmul.mubr.msk.f32.vlgmr.msra.gmra.mrb[22].mxu0 %vm41_vm0, %v38_v27 }
0x28b4   :  { %v2439_v35 = vpop.f32.mrb[22].mxu0 }
0x28b5   :  { %v2822_v18 = vpop.f32.mrb[23].mxu0  ;;  %2832 = vmatmul.mubr.msk.f32.vlgmr.msra.gmra.mrb[20].mxu1 %vm2196_vm15, %v2439_v35 }
0x2988   :  { %v2516_v20 = vpop.f32.mrb[20].mxu1 }
0x2989   :  { %v2517_v21 = vadd.f32 %v2516_v20, %v2446_v24  ;;  %v2833_v25 = vpop.f32.mrb[21].mxu1 }
0x298b   :  { %2520 = vst [vmem:[%s3406_s2] sm:$0x3] %v2517_v21 }

</bundles_post_ra>
